<compile_context>
chip_gen: v5e
topology: v5e:2x2
jax: 0.10.0
libtpu: 0.0.40
codegen_flags: <defaults>
</compile_context>

<pallas_src>
import functools

import jax
import jax.numpy as jnp
from jax.experimental import pallas as pl
from jax.experimental.pallas import tpu as pltpu

EPS = 1e-5  # PyTorch nn.LayerNorm default eps
VMEM_LIMIT = 32 * 1024 * 1024  # fits scoped-VMEM defaults on v5e/v6e/v7x


def _round_up(x, m):
    return (x + m - 1) // m * m


# ----------------------------- Pallas kernels ------------------------------

def _layernorm_kernel(x_ref, g_ref, b_ref, o_ref):
    x = x_ref[...].astype(jnp.float32)
    mean = jnp.mean(x, axis=-1, keepdims=True)
    var = jnp.mean(jnp.square(x - mean), axis=-1, keepdims=True)
    y = (x - mean) * jax.lax.rsqrt(var + EPS)
    o_ref[...] = (y * g_ref[...] + b_ref[...]).astype(o_ref.dtype)


def layernorm(x2d, gamma, beta, *, tm=512):
    """Row-tiled LayerNorm over the last dim of an (M, D) slab."""
    M, D = x2d.shape
    tm = min(_round_up(M, 8), tm)
    Mp = _round_up(M, tm)
    xp = jnp.pad(x2d, ((0, Mp - M), (0, 0))) if Mp != M else x2d

    out = pl.pallas_call(
        _layernorm_kernel,
        out_shape=jax.ShapeDtypeStruct((Mp, D), x2d.dtype),
        grid=(Mp // tm,),
        in_specs=[
            pl.BlockSpec((tm, D), lambda i: (i, 0)),
            pl.BlockSpec((1, D), lambda i: (0, 0)),
            pl.BlockSpec((1, D), lambda i: (0, 0)),
        ],
        out_specs=pl.BlockSpec((tm, D), lambda i: (i, 0)),
        compiler_params=pltpu.CompilerParams(
            dimension_semantics=("parallel",),
            vmem_limit_bytes=VMEM_LIMIT),
        cost_estimate=pl.CostEstimate(
            flops=int(8 * Mp * D), transcendentals=0,
            bytes_accessed=int(4 * (2 * Mp * D + 2 * D))),
    )(xp, gamma.reshape(1, D).astype(jnp.float32),
      beta.reshape(1, D).astype(jnp.float32))
    return out[:M] if Mp != M else out


def _linear_kernel(*args, nk, fuse_ln, has_bias, act, out_ln, fuse_res):
    """out = [post-LN]( [pre-LN](x) @ w [+ bias] [gelu] ) [+ residual]."""
    it = iter(args)
    x_ref = next(it)
    g_ref = next(it) if fuse_ln else None
    bln_ref = next(it) if fuse_ln else None
    w_ref = next(it)
    bias_ref = next(it) if has_bias else None
    og_ref = next(it) if out_ln else None
    ob_ref = next(it) if out_ln else None
    res_ref = next(it) if fuse_res else None
    o_ref = next(it)
    acc_ref = next(it) if nk > 1 else None

    x = x_ref[...].astype(jnp.float32)
    if fuse_ln:  # the full K row is resident in this block (tk == K, unpadded)
        mean = jnp.mean(x, axis=-1, keepdims=True)
        var = jnp.mean(jnp.square(x - mean), axis=-1, keepdims=True)
        x = (x - mean) * jax.lax.rsqrt(var + EPS)
        x = x * g_ref[...].astype(jnp.float32) + bln_ref[...].astype(jnp.float32)

    partial = jnp.dot(x, w_ref[...].astype(jnp.float32),
                      preferred_element_type=jnp.float32)

    def epilogue(y):
        if has_bias:
            y = y + bias_ref[...].astype(jnp.float32)
        if act == "gelu":
            # exact (erf) GELU, matching torch.nn.GELU()
            y = 0.5 * y * (1.0 + jax.lax.erf(y * 0.7071067811865476))
        if out_ln:  # the full (unpadded) N row is resident in this block
            mean = jnp.mean(y, axis=-1, keepdims=True)
            var = jnp.mean(jnp.square(y - mean), axis=-1, keepdims=True)
            y = (y - mean) * jax.lax.rsqrt(var + EPS)
            y = y * og_ref[...].astype(jnp.float32) + ob_ref[...].astype(jnp.float32)
        if fuse_res:
            y = y + res_ref[...].astype(jnp.float32)
        return y.astype(o_ref.dtype)

    if nk == 1:
        o_ref[...] = epilogue(partial)
    else:
        k = pl.program_id(2)

        @pl.when(k == 0)
        def _init():
            acc_ref[...] = jnp.zeros_like(acc_ref)

        acc_ref[...] += partial

        @pl.when(k == nk - 1)
        def _finalize():
            o_ref[...] = epilogue(acc_ref[...])


def fused_linear(x2d, w, bias=None, *, gamma=None, beta=None, act="none",
                 out_gamma=None, out_beta=None, residual=None,
                 tm=256, tn=256, tk=512):
    """Tiled linear layer with optional fused pre-LN / GELU / post-LN / residual."""
    M, K = x2d.shape
    Kw, N = w.shape
    assert Kw == K
    fuse_ln = gamma is not None
    has_bias = bias is not None
    out_ln = out_gamma is not None
    fuse_res = residual is not None

    tm = min(_round_up(M, 8), tm)
    # Pre-LN needs the whole (unpadded) K row; post-LN the whole N row.
    tk_eff = K if fuse_ln else min(_round_up(K, 128), tk)
    tn_eff = N if out_ln else min(_round_up(N, 128), tn)

    Mp = _round_up(M, tm)
    Np = _round_up(N, tn_eff)
    Kp = _round_up(K, tk_eff)
    nk = Kp // tk_eff

    xp = jnp.pad(x2d, ((0, Mp - M), (0, Kp - K))) if (Mp, Kp) != (M, K) else x2d
    wp = jnp.pad(w, ((0, Kp - K), (0, Np - N))) if (Kp, Np) != (K, N) else w

    args = [xp]
    in_specs = [pl.BlockSpec((tm, tk_eff), lambda i, j, k: (i, k))]
    if fuse_ln:
        args += [gamma.reshape(1, K).astype(jnp.float32),
                 beta.reshape(1, K).astype(jnp.float32)]
        in_specs += [pl.BlockSpec((1, K), lambda i, j, k: (0, 0)),
                     pl.BlockSpec((1, K), lambda i, j, k: (0, 0))]
    args.append(wp)
    in_specs.append(pl.BlockSpec((tk_eff, tn_eff), lambda i, j, k: (k, j)))
    if has_bias:
        bp = bias.reshape(1, N)
        if Np != N:
            bp = jnp.pad(bp, ((0, 0), (0, Np - N)))
        args.append(bp)
        in_specs.append(pl.BlockSpec((1, tn_eff), lambda i, j, k: (0, j)))
    if out_ln:
        args += [out_gamma.reshape(1, N).astype(jnp.float32),
                 out_beta.reshape(1, N).astype(jnp.float32)]
        in_specs += [pl.BlockSpec((1, N), lambda i, j, k: (0, 0)),
                     pl.BlockSpec((1, N), lambda i, j, k: (0, 0))]
    if fuse_res:
        rp = residual
        if rp.shape != (Mp, Np):
            rp = jnp.pad(rp, ((0, Mp - M), (0, Np - N)))
        args.append(rp)
        in_specs.append(pl.BlockSpec((tm, tn_eff), lambda i, j, k: (i, j)))

    scratch = [pltpu.VMEM((tm, tn_eff), jnp.float32)] if nk > 1 else []

    cost = pl.CostEstimate(
        flops=int(2 * Mp * Kp * Np),
        transcendentals=int(Mp * Np) if act == "gelu" else 0,
        bytes_accessed=int(4 * (Mp * Kp + Kp * Np + 2 * Mp * Np)))

    out = pl.pallas_call(
        functools.partial(_linear_kernel, nk=nk, fuse_ln=fuse_ln,
                          has_bias=has_bias, act=act, out_ln=out_ln,
                          fuse_res=fuse_res),
        out_shape=jax.ShapeDtypeStruct((Mp, Np), x2d.dtype),
        grid_spec=pltpu.PrefetchScalarGridSpec(
            num_scalar_prefetch=0,
            grid=(Mp // tm, Np // tn_eff, nk),
            in_specs=in_specs,
            out_specs=pl.BlockSpec((tm, tn_eff), lambda i, j, k: (i, j)),
            scratch_shapes=scratch),
        compiler_params=pltpu.CompilerParams(
            dimension_semantics=("parallel", "parallel", "arbitrary"),
            vmem_limit_bytes=VMEM_LIMIT),
        cost_estimate=cost,
    )(*args)

    if (Mp, Np) != (M, N):
        out = out[:M, :N]
    return out


def _attention_kernel(q_ref, k_ref, v_ref, o_ref, *, scale):
    # Blocks are (heads, N, Dh): all heads of one image per grid step.
    q = q_ref[...].astype(jnp.float32) * scale
    k = k_ref[...].astype(jnp.float32)
    v = v_ref[...].astype(jnp.float32)
    # scores (H, N, N): contract Dh, batch over heads (no explicit transpose)
    s = jax.lax.dot_general(q, k, (((2,), (2,)), ((0,), (0,))),
                            preferred_element_type=jnp.float32)
    s = s - jnp.max(s, axis=-1, keepdims=True)
    p = jnp.exp(s)
    denom = jnp.sum(p, axis=-1, keepdims=True)
    p = p * pl.reciprocal(denom, approx=True)
    o = jax.lax.dot_general(p, v, (((2,), (1,)), ((0,), (0,))),
                            preferred_element_type=jnp.float32)
    o_ref[...] = o.astype(o_ref.dtype)


def attention_core(q, k, v, scale, heads):
    # q, k, v: (B*heads, N, Dh) — grid over batch, all heads per block.
    BH, N, Dh = q.shape
    B = BH // heads
    cost = pl.CostEstimate(
        flops=int(4 * BH * N * N * Dh),
        transcendentals=int(BH * N * N),
        bytes_accessed=int(4 * 4 * BH * N * Dh))
    spec = pl.BlockSpec((heads, N, Dh), lambda b: (b, 0, 0))
    return pl.pallas_call(
        functools.partial(_attention_kernel, scale=scale),
        out_shape=jax.ShapeDtypeStruct((BH, N, Dh), q.dtype),
        grid=(B,),
        in_specs=[spec, spec, spec],
        out_specs=spec,
        compiler_params=pltpu.CompilerParams(
            dimension_semantics=("parallel",),
            vmem_limit_bytes=VMEM_LIMIT),
        cost_estimate=cost,
    )(q, k, v)


# --------------------------- parameter creation -----------------------------

def init_params(key, *, channels, patch_size, dim, depth, heads, dim_head,
                mlp_dim, num_patches, num_classes):
    patch_dim = channels * patch_size * patch_size
    inner = heads * dim_head
    ks = iter(jax.random.split(key, 16 + depth * 8))

    def w(k, shape, scale=0.02):
        return (scale * jax.random.normal(k, shape)).astype(jnp.float32)

    params = {
        "patch_ln1_g": jnp.ones((patch_dim,), jnp.float32),
        "patch_ln1_b": jnp.zeros((patch_dim,), jnp.float32),
        "patch_w": w(next(ks), (patch_dim, dim)),
        "patch_b": jnp.zeros((dim,), jnp.float32),
        "patch_ln2_g": jnp.ones((dim,), jnp.float32),
        "patch_ln2_b": jnp.zeros((dim,), jnp.float32),
        "pos_embedding": w(next(ks), (1, num_patches + 1, dim), scale=1.0),
        "cls_token": w(next(ks), (1, 1, dim), scale=1.0),
        "final_ln_g": jnp.ones((dim,), jnp.float32),
        "final_ln_b": jnp.zeros((dim,), jnp.float32),
        "head_w": w(next(ks), (dim, num_classes)),
        "head_b": jnp.zeros((num_classes,), jnp.float32),
        "layers": [],
    }
    for _ in range(depth):
        layer = {
            "attn_ln_g": jnp.ones((dim,), jnp.float32),
            "attn_ln_b": jnp.zeros((dim,), jnp.float32),
            "w_qkv": w(next(ks), (dim, 3 * inner)),       # bias-free (to_qkv)
            "w_out": w(next(ks), (inner, dim)),
            "b_out": jnp.zeros((dim,), jnp.float32),
            "ff_ln_g": jnp.ones((dim,), jnp.float32),
            "ff_ln_b": jnp.zeros((dim,), jnp.float32),
            "w1": w(next(ks), (dim, mlp_dim)),
            "b1": jnp.zeros((mlp_dim,), jnp.float32),
            "w2": w(next(ks), (mlp_dim, dim)),
            "b2": jnp.zeros((dim,), jnp.float32),
        }
        params["layers"].append(layer)
    return params


# ------------------------------- ViT forward --------------------------------

def vit_forward(img, params, *, patch_size, heads, dim_head, pool="cls"):
    B, C, H, W = img.shape
    p = patch_size
    hh, ww = H // p, W // p
    n = hh * ww
    patch_dim = p * p * C
    dim = params["patch_w"].shape[1]
    inner = heads * dim_head
    scale = dim_head ** (-0.5)

    # Rearrange 'b c (h p1) (w p2) -> b (h w) (p1 p2 c)'
    x = img.reshape(B, C, hh, p, ww, p)
    x = x.transpose(0, 2, 4, 3, 5, 1)
    x = x.reshape(B, n, patch_dim)

    # Patch embedding: LN(patch_dim) + Linear + LN(dim) fused into one kernel.
    xf = fused_linear(x.reshape(B * n, patch_dim), params["patch_w"],
                      params["patch_b"],
                      gamma=params["patch_ln1_g"], beta=params["patch_ln1_b"],
                      out_gamma=params["patch_ln2_g"],
                      out_beta=params["patch_ln2_b"])
    x = xf.reshape(B, n, dim)

    # cls token + positional embedding (dropout p=0 -> identity)
    cls = jnp.broadcast_to(params["cls_token"], (B, 1, dim))
    x = jnp.concatenate([cls, x], axis=1)
    x = x + params["pos_embedding"][:, : n + 1]
    N = n + 1

    def split_heads(t):
        return t.reshape(B, N, heads, dim_head).transpose(0, 2, 1, 3).reshape(
            B * heads, N, dim_head)

    xf = x.reshape(B * N, dim)
    for layer in params["layers"]:
        # ---- Attention block: fused LN+qkv, per-batch multi-head attention,
        # ---- out-projection with fused residual add ----
        qkv = fused_linear(xf, layer["w_qkv"],
                           gamma=layer["attn_ln_g"], beta=layer["attn_ln_b"])
        q, k, v = jnp.split(qkv, 3, axis=-1)
        o = attention_core(split_heads(q), split_heads(k), split_heads(v),
                           scale, heads)
        o = o.reshape(B, heads, N, dim_head).transpose(0, 2, 1, 3)
        o = o.reshape(B * N, inner)
        xf = fused_linear(o, layer["w_out"], layer["b_out"], residual=xf)

        # ---- FeedForward block: fused LN+Linear+GELU, then Linear+residual ----
        h = fused_linear(xf, layer["w1"], layer["b1"],
                         gamma=layer["ff_ln_g"], beta=layer["ff_ln_b"],
                         act="gelu")
        xf = fused_linear(h, layer["w2"], layer["b2"], residual=xf)

    if pool == "mean":
        # final transformer LayerNorm over all tokens, then mean-pool
        xf = layernorm(xf, params["final_ln_g"], params["final_ln_b"])
        pooled = xf.reshape(B, N, dim).mean(axis=1)
        return fused_linear(pooled, params["head_w"], params["head_b"])
    # cls pooling: LN is per-row, so pool first and fuse the final LN into the
    # classifier head (saves one kernel launch / HBM round trip).
    pooled = xf.reshape(B, N, dim)[:, 0]
    return fused_linear(pooled, params["head_w"], params["head_b"],
                        gamma=params["final_ln_g"], beta=params["final_ln_b"])


# ---------------------------------- main -------------------------------------

if __name__ == "__main__":
    # small ViT config
    batch = 2
    channels = 3
    image_size = 16
    patch_size = 8
    dim = 32
    depth = 2
    heads = 4
    dim_head = 8
    mlp_dim = 64
    num_classes = 10
    num_patches = (image_size // patch_size) ** 2  # 4

    key = jax.random.PRNGKey(0)
    k_img, k_params = jax.random.split(key)

    img = jax.random.normal(k_img, (batch, channels, image_size, image_size),
                            dtype=jnp.float32)
    params = init_params(k_params, channels=channels, patch_size=patch_size,
                         dim=dim, depth=depth, heads=heads, dim_head=dim_head,
                         mlp_dim=mlp_dim, num_patches=num_patches,
                         num_classes=num_classes)

    fwd = jax.jit(functools.partial(vit_forward, patch_size=patch_size,
                                    heads=heads, dim_head=dim_head, pool="cls"))
    logits = fwd(img, params)
    jax.block_until_ready(logits)
    assert logits.shape == (batch, num_classes)
    print("KERNEL_OK")
</pallas_src>

<mosaic_0001>
module attributes {stable_mosaic.version = 11 : i64} {
  func.func @_linear_kernel(%arg0: i32, %arg1: i32, %arg2: i32, %arg3: memref<8x192xf32, #tpu.memory_space<vmem>>, %arg4: memref<1x192xf32, #tpu.memory_space<vmem>>, %arg5: memref<1x192xf32, #tpu.memory_space<vmem>>, %arg6: memref<192x32xf32, #tpu.memory_space<vmem>>, %arg7: memref<1x32xf32, #tpu.memory_space<vmem>>, %arg8: memref<1x32xf32, #tpu.memory_space<vmem>>, %arg9: memref<1x32xf32, #tpu.memory_space<vmem>>, %arg10: memref<8x32xf32, #tpu.memory_space<vmem>>) attributes {dimension_semantics = [#tpu.dimension_semantics<parallel>, #tpu.dimension_semantics<parallel>, #tpu.dimension_semantics<arbitrary>], iteration_bounds = array<i64: 1, 1, 1>, scalar_prefetch = 0 : i64, scratch_operands = 0 : i64, tpu.core_type = #tpu.core_type<tc>, window_params = [{transform_indices = @transform_0, window_bounds = array<i64: 8, 192>}, {pipeline_mode = #tpu.pipeline_mode<synchronous>, transform_indices = @transform_1, window_bounds = array<i64: 1, 192>}, {pipeline_mode = #tpu.pipeline_mode<synchronous>, transform_indices = @transform_2, window_bounds = array<i64: 1, 192>}, {transform_indices = @transform_3, window_bounds = array<i64: 192, 32>}, {transform_indices = @transform_4, window_bounds = array<i64: 1, 32>}, {pipeline_mode = #tpu.pipeline_mode<synchronous>, transform_indices = @transform_5, window_bounds = array<i64: 1, 32>}, {pipeline_mode = #tpu.pipeline_mode<synchronous>, transform_indices = @transform_6, window_bounds = array<i64: 1, 32>}, {transform_indices = @transform_7, window_bounds = array<i64: 8, 32>}]} {
    %c0 = arith.constant 0 : index
    %c0_0 = arith.constant 0 : index
    %0 = vector.load %arg3[%c0, %c0_0] : memref<8x192xf32, #tpu.memory_space<vmem>>, vector<8x192xf32>
    %cst = arith.constant dense<0.000000e+00> : vector<8xf32>
    %1 = vector.multi_reduction <add>, %0, %cst [1] : vector<8x192xf32> to vector<8xf32>
    %2 = vector.shape_cast %1 : vector<8xf32> to vector<8x1xf32>
    %cst_1 = arith.constant 1.920000e+02 : f32
    %3 = vector.broadcast %cst_1 : f32 to vector<8x1xf32>
    %4 = arith.divf %2, %3 : vector<8x1xf32>
    %5 = vector.broadcast %4 : vector<8x1xf32> to vector<8x192xf32>
    %6 = arith.subf %0, %5 : vector<8x192xf32>
    %7 = arith.mulf %6, %6 : vector<8x192xf32>
    %cst_2 = arith.constant dense<0.000000e+00> : vector<8xf32>
    %8 = vector.multi_reduction <add>, %7, %cst_2 [1] : vector<8x192xf32> to vector<8xf32>
    %9 = vector.shape_cast %8 : vector<8xf32> to vector<8x1xf32>
    %cst_3 = arith.constant 1.920000e+02 : f32
    %10 = vector.broadcast %cst_3 : f32 to vector<8x1xf32>
    %11 = arith.divf %9, %10 : vector<8x1xf32>
    %12 = vector.broadcast %4 : vector<8x1xf32> to vector<8x192xf32>
    %13 = arith.subf %0, %12 : vector<8x192xf32>
    %cst_4 = arith.constant 9.99999974E-6 : f32
    %14 = vector.broadcast %cst_4 : f32 to vector<8x1xf32>
    %15 = arith.addf %11, %14 : vector<8x1xf32>
    %16 = math.rsqrt %15 : vector<8x1xf32>
    %17 = vector.broadcast %16 : vector<8x1xf32> to vector<8x192xf32>
    %18 = arith.mulf %13, %17 : vector<8x192xf32>
    %c0_5 = arith.constant 0 : index
    %c0_6 = arith.constant 0 : index
    %19 = vector.load %arg4[%c0_5, %c0_6] : memref<1x192xf32, #tpu.memory_space<vmem>>, vector<1x192xf32>
    %20 = vector.broadcast %19 : vector<1x192xf32> to vector<8x192xf32>
    %21 = arith.mulf %18, %20 : vector<8x192xf32>
    %c0_7 = arith.constant 0 : index
    %c0_8 = arith.constant 0 : index
    %22 = vector.load %arg5[%c0_7, %c0_8] : memref<1x192xf32, #tpu.memory_space<vmem>>, vector<1x192xf32>
    %23 = vector.broadcast %22 : vector<1x192xf32> to vector<8x192xf32>
    %24 = arith.addf %21, %23 : vector<8x192xf32>
    %c0_9 = arith.constant 0 : index
    %c0_10 = arith.constant 0 : index
    %25 = vector.load %arg6[%c0_9, %c0_10] : memref<192x32xf32, #tpu.memory_space<vmem>>, vector<192x32xf32>
    %cst_11 = arith.constant dense<0.000000e+00> : vector<8x32xf32>
    %26 = tpu.matmul %24, %25, %cst_11 {dimension_numbers = #tpu.dot_dimension_numbers<[1], [0], [0], [1], [0, 0, 1, 1], [], []>} : vector<8x192xf32>, vector<192x32xf32>, vector<8x32xf32> -> vector<8x32xf32>
    %c0_12 = arith.constant 0 : index
    %c0_13 = arith.constant 0 : index
    %27 = vector.load %arg7[%c0_12, %c0_13] : memref<1x32xf32, #tpu.memory_space<vmem>>, vector<1x32xf32>
    %28 = vector.broadcast %27 : vector<1x32xf32> to vector<8x32xf32>
    %29 = arith.addf %26, %28 : vector<8x32xf32>
    %cst_14 = arith.constant dense<0.000000e+00> : vector<8xf32>
    %30 = vector.multi_reduction <add>, %29, %cst_14 [1] : vector<8x32xf32> to vector<8xf32>
    %31 = vector.shape_cast %30 : vector<8xf32> to vector<8x1xf32>
    %cst_15 = arith.constant 3.200000e+01 : f32
    %32 = vector.broadcast %cst_15 : f32 to vector<8x1xf32>
    %33 = arith.divf %31, %32 : vector<8x1xf32>
    %34 = vector.broadcast %33 : vector<8x1xf32> to vector<8x32xf32>
    %35 = arith.subf %29, %34 : vector<8x32xf32>
    %36 = arith.mulf %35, %35 : vector<8x32xf32>
    %cst_16 = arith.constant dense<0.000000e+00> : vector<8xf32>
    %37 = vector.multi_reduction <add>, %36, %cst_16 [1] : vector<8x32xf32> to vector<8xf32>
    %38 = vector.shape_cast %37 : vector<8xf32> to vector<8x1xf32>
    %cst_17 = arith.constant 3.200000e+01 : f32
    %39 = vector.broadcast %cst_17 : f32 to vector<8x1xf32>
    %40 = arith.divf %38, %39 : vector<8x1xf32>
    %41 = vector.broadcast %33 : vector<8x1xf32> to vector<8x32xf32>
    %42 = arith.subf %29, %41 : vector<8x32xf32>
    %cst_18 = arith.constant 9.99999974E-6 : f32
    %43 = vector.broadcast %cst_18 : f32 to vector<8x1xf32>
    %44 = arith.addf %40, %43 : vector<8x1xf32>
    %45 = math.rsqrt %44 : vector<8x1xf32>
    %46 = vector.broadcast %45 : vector<8x1xf32> to vector<8x32xf32>
    %47 = arith.mulf %42, %46 : vector<8x32xf32>
    %c0_19 = arith.constant 0 : index
    %c0_20 = arith.constant 0 : index
    %48 = vector.load %arg8[%c0_19, %c0_20] : memref<1x32xf32, #tpu.memory_space<vmem>>, vector<1x32xf32>
    %49 = vector.broadcast %48 : vector<1x32xf32> to vector<8x32xf32>
    %50 = arith.mulf %47, %49 : vector<8x32xf32>
    %c0_21 = arith.constant 0 : index
    %c0_22 = arith.constant 0 : index
    %51 = vector.load %arg9[%c0_21, %c0_22] : memref<1x32xf32, #tpu.memory_space<vmem>>, vector<1x32xf32>
    %52 = vector.broadcast %51 : vector<1x32xf32> to vector<8x32xf32>
    %53 = arith.addf %50, %52 : vector<8x32xf32>
    %c0_23 = arith.constant 0 : index
    %c0_24 = arith.constant 0 : index
    %54 = vector.load %arg10[%c0_23, %c0_24] : memref<8x32xf32, #tpu.memory_space<vmem>>, vector<8x32xf32>
    tpu.vector_store %arg10[%c0_23, %c0_24], %53 {strides = array<i32>} : memref<8x32xf32, #tpu.memory_space<vmem>>, vector<8x32xf32>,
    return
  }
  func.func @transform_0(%arg0: i32, %arg1: i32, %arg2: i32) -> (i32, i32) {
    %c0_i32 = arith.constant 0 : i32
    return %arg0, %arg2 : i32, i32
  }
  func.func @transform_1(%arg0: i32, %arg1: i32, %arg2: i32) -> (i32, i32) {
    %c0_i32 = arith.constant 0 : i32
    %c0_i32_0 = arith.constant 0 : i32
    %c0_i32_1 = arith.constant 0 : i32
    return %c0_i32, %c0_i32_0 : i32, i32
  }
  func.func @transform_2(%arg0: i32, %arg1: i32, %arg2: i32) -> (i32, i32) {
    %c0_i32 = arith.constant 0 : i32
    %c0_i32_0 = arith.constant 0 : i32
    %c0_i32_1 = arith.constant 0 : i32
    return %c0_i32, %c0_i32_0 : i32, i32
  }
  func.func @transform_3(%arg0: i32, %arg1: i32, %arg2: i32) -> (i32, i32) {
    %c0_i32 = arith.constant 0 : i32
    return %arg2, %arg1 : i32, i32
  }
  func.func @transform_4(%arg0: i32, %arg1: i32, %arg2: i32) -> (i32, i32) {
    %c0_i32 = arith.constant 0 : i32
    %c0_i32_0 = arith.constant 0 : i32
    return %c0_i32, %arg1 : i32, i32
  }
  func.func @transform_5(%arg0: i32, %arg1: i32, %arg2: i32) -> (i32, i32) {
    %c0_i32 = arith.constant 0 : i32
    %c0_i32_0 = arith.constant 0 : i32
    %c0_i32_1 = arith.constant 0 : i32
    return %c0_i32, %c0_i32_0 : i32, i32
  }
  func.func @transform_6(%arg0: i32, %arg1: i32, %arg2: i32) -> (i32, i32) {
    %c0_i32 = arith.constant 0 : i32
    %c0_i32_0 = arith.constant 0 : i32
    %c0_i32_1 = arith.constant 0 : i32
    return %c0_i32, %c0_i32_0 : i32, i32
  }
  func.func @transform_7(%arg0: i32, %arg1: i32, %arg2: i32) -> (i32, i32) {
    %c0_i32 = arith.constant 0 : i32
    return %arg0, %arg1 : i32, i32
  }
}

module attributes {stable_mosaic.version = 11 : i64} {
  func.func @_linear_kernel(%arg0: i32, %arg1: i32, %arg2: i32, %arg3: memref<16x32xf32, #tpu.memory_space<vmem>>, %arg4: memref<1x32xf32, #tpu.memory_space<vmem>>, %arg5: memref<1x32xf32, #tpu.memory_space<vmem>>, %arg6: memref<32x128xf32, #tpu.memory_space<vmem>>, %arg7: memref<16x128xf32, #tpu.memory_space<vmem>>) attributes {dimension_semantics = [#tpu.dimension_semantics<parallel>, #tpu.dimension_semantics<parallel>, #tpu.dimension_semantics<arbitrary>], iteration_bounds = array<i64: 1, 1, 1>, scalar_prefetch = 0 : i64, scratch_operands = 0 : i64, tpu.core_type = #tpu.core_type<tc>, window_params = [{transform_indices = @transform_0, window_bounds = array<i64: 16, 32>}, {pipeline_mode = #tpu.pipeline_mode<synchronous>, transform_indices = @transform_1, window_bounds = array<i64: 1, 32>}, {pipeline_mode = #tpu.pipeline_mode<synchronous>, transform_indices = @transform_2, window_bounds = array<i64: 1, 32>}, {transform_indices = @transform_3, window_bounds = array<i64: 32, 128>}, {transform_indices = @transform_4, window_bounds = array<i64: 16, 128>}]} {
    %c0 = arith.constant 0 : index
    %c0_0 = arith.constant 0 : index
    %0 = vector.load %arg3[%c0, %c0_0] : memref<16x32xf32, #tpu.memory_space<vmem>>, vector<16x32xf32>
    %cst = arith.constant dense<0.000000e+00> : vector<16xf32>
    %1 = vector.multi_reduction <add>, %0, %cst [1] : vector<16x32xf32> to vector<16xf32>
    %2 = vector.shape_cast %1 : vector<16xf32> to vector<16x1xf32>
    %cst_1 = arith.constant 3.200000e+01 : f32
    %3 = vector.broadcast %cst_1 : f32 to vector<16x1xf32>
    %4 = arith.divf %2, %3 : vector<16x1xf32>
    %5 = vector.broadcast %4 : vector<16x1xf32> to vector<16x32xf32>
    %6 = arith.subf %0, %5 : vector<16x32xf32>
    %7 = arith.mulf %6, %6 : vector<16x32xf32>
    %cst_2 = arith.constant dense<0.000000e+00> : vector<16xf32>
    %8 = vector.multi_reduction <add>, %7, %cst_2 [1] : vector<16x32xf32> to vector<16xf32>
    %9 = vector.shape_cast %8 : vector<16xf32> to vector<16x1xf32>
    %cst_3 = arith.constant 3.200000e+01 : f32
    %10 = vector.broadcast %cst_3 : f32 to vector<16x1xf32>
    %11 = arith.divf %9, %10 : vector<16x1xf32>
    %12 = vector.broadcast %4 : vector<16x1xf32> to vector<16x32xf32>
    %13 = arith.subf %0, %12 : vector<16x32xf32>
    %cst_4 = arith.constant 9.99999974E-6 : f32
    %14 = vector.broadcast %cst_4 : f32 to vector<16x1xf32>
    %15 = arith.addf %11, %14 : vector<16x1xf32>
    %16 = math.rsqrt %15 : vector<16x1xf32>
    %17 = vector.broadcast %16 : vector<16x1xf32> to vector<16x32xf32>
    %18 = arith.mulf %13, %17 : vector<16x32xf32>
    %c0_5 = arith.constant 0 : index
    %c0_6 = arith.constant 0 : index
    %19 = vector.load %arg4[%c0_5, %c0_6] : memref<1x32xf32, #tpu.memory_space<vmem>>, vector<1x32xf32>
    %20 = vector.broadcast %19 : vector<1x32xf32> to vector<16x32xf32>
    %21 = arith.mulf %18, %20 : vector<16x32xf32>
    %c0_7 = arith.constant 0 : index
    %c0_8 = arith.constant 0 : index
    %22 = vector.load %arg5[%c0_7, %c0_8] : memref<1x32xf32, #tpu.memory_space<vmem>>, vector<1x32xf32>
    %23 = vector.broadcast %22 : vector<1x32xf32> to vector<16x32xf32>
    %24 = arith.addf %21, %23 : vector<16x32xf32>
    %c0_9 = arith.constant 0 : index
    %c0_10 = arith.constant 0 : index
    %25 = vector.load %arg6[%c0_9, %c0_10] : memref<32x128xf32, #tpu.memory_space<vmem>>, vector<32x128xf32>
    %cst_11 = arith.constant dense<0.000000e+00> : vector<16x128xf32>
    %26 = tpu.matmul %24, %25, %cst_11 {dimension_numbers = #tpu.dot_dimension_numbers<[1], [0], [0], [1], [0, 0, 1, 1], [], []>} : vector<16x32xf32>, vector<32x128xf32>, vector<16x128xf32> -> vector<16x128xf32>
    %c0_12 = arith.constant 0 : index
    %c0_13 = arith.constant 0 : index
    %27 = vector.load %arg7[%c0_12, %c0_13] : memref<16x128xf32, #tpu.memory_space<vmem>>, vector<16x128xf32>
    tpu.vector_store %arg7[%c0_12, %c0_13], %26 {strides = array<i32>} : memref<16x128xf32, #tpu.memory_space<vmem>>, vector<16x128xf32>,
    return
  }
  func.func @transform_0(%arg0: i32, %arg1: i32, %arg2: i32) -> (i32, i32) {
    %c0_i32 = arith.constant 0 : i32
    return %arg0, %arg2 : i32, i32
  }
  func.func @transform_1(%arg0: i32, %arg1: i32, %arg2: i32) -> (i32, i32) {
    %c0_i32 = arith.constant 0 : i32
    %c0_i32_0 = arith.constant 0 : i32
    %c0_i32_1 = arith.constant 0 : i32
    return %c0_i32, %c0_i32_0 : i32, i32
  }
  func.func @transform_2(%arg0: i32, %arg1: i32, %arg2: i32) -> (i32, i32) {
    %c0_i32 = arith.constant 0 : i32
    %c0_i32_0 = arith.constant 0 : i32
    %c0_i32_1 = arith.constant 0 : i32
    return %c0_i32, %c0_i32_0 : i32, i32
  }
  func.func @transform_3(%arg0: i32, %arg1: i32, %arg2: i32) -> (i32, i32) {
    %c0_i32 = arith.constant 0 : i32
    return %arg2, %arg1 : i32, i32
  }
  func.func @transform_4(%arg0: i32, %arg1: i32, %arg2: i32) -> (i32, i32) {
    %c0_i32 = arith.constant 0 : i32
    return %arg0, %arg1 : i32, i32
  }
}

module attributes {stable_mosaic.version = 11 : i64} {
  func.func @_attention_kernel(%arg0: i32, %arg1: memref<4x5x8xf32, #tpu.memory_space<vmem>>, %arg2: memref<4x5x8xf32, #tpu.memory_space<vmem>>, %arg3: memref<4x5x8xf32, #tpu.memory_space<vmem>>, %arg4: memref<4x5x8xf32, #tpu.memory_space<vmem>>) attributes {dimension_semantics = [#tpu.dimension_semantics<parallel>], iteration_bounds = array<i64: 2>, scalar_prefetch = 0 : i64, scratch_operands = 0 : i64, tpu.core_type = #tpu.core_type<tc>, window_params = [{transform_indices = @transform_0, window_bounds = array<i64: 4, 5, 8>}, {transform_indices = @transform_1, window_bounds = array<i64: 4, 5, 8>}, {transform_indices = @transform_2, window_bounds = array<i64: 4, 5, 8>}, {transform_indices = @transform_3, window_bounds = array<i64: 4, 5, 8>}]} {
    %c0 = arith.constant 0 : index
    %c0_0 = arith.constant 0 : index
    %c0_1 = arith.constant 0 : index
    %0 = vector.load %arg1[%c0, %c0_0, %c0_1] : memref<4x5x8xf32, #tpu.memory_space<vmem>>, vector<4x5x8xf32>
    %cst = arith.constant 0.353553385 : f32
    %1 = vector.broadcast %cst : f32 to vector<4x5x8xf32>
    %2 = arith.mulf %0, %1 : vector<4x5x8xf32>
    %c0_2 = arith.constant 0 : index
    %c0_3 = arith.constant 0 : index
    %c0_4 = arith.constant 0 : index
    %3 = vector.load %arg2[%c0_2, %c0_3, %c0_4] : memref<4x5x8xf32, #tpu.memory_space<vmem>>, vector<4x5x8xf32>
    %c0_5 = arith.constant 0 : index
    %c0_6 = arith.constant 0 : index
    %c0_7 = arith.constant 0 : index
    %4 = vector.load %arg3[%c0_5, %c0_6, %c0_7] : memref<4x5x8xf32, #tpu.memory_space<vmem>>, vector<4x5x8xf32>
    %cst_8 = arith.constant dense<0.000000e+00> : vector<4x5x5xf32>
    %5 = tpu.matmul %2, %3, %cst_8 {dimension_numbers = #tpu.dot_dimension_numbers<[2], [2], [1], [1], [0, 0, 0, 1, 1, 1], [0], [0]>} : vector<4x5x8xf32>, vector<4x5x8xf32>, vector<4x5x5xf32> -> vector<4x5x5xf32>
    %cst_9 = arith.constant dense<0xFF800000> : vector<4x5xf32>
    %6 = vector.multi_reduction <maximumf>, %5, %cst_9 [2] : vector<4x5x5xf32> to vector<4x5xf32>
    %7 = vector.shape_cast %6 : vector<4x5xf32> to vector<4x5x1xf32>
    %8 = vector.broadcast %7 : vector<4x5x1xf32> to vector<4x5x5xf32>
    %9 = arith.subf %5, %8 : vector<4x5x5xf32>
    %10 = math.exp %9 : vector<4x5x5xf32>
    %cst_10 = arith.constant dense<0.000000e+00> : vector<4x5xf32>
    %11 = vector.multi_reduction <add>, %10, %cst_10 [2] : vector<4x5x5xf32> to vector<4x5xf32>
    %12 = vector.shape_cast %11 : vector<4x5xf32> to vector<4x5x1xf32>
    %13 = tpu.reciprocal %12 {approx = true} : vector<4x5x1xf32> -> vector<4x5x1xf32>
    %14 = vector.broadcast %13 : vector<4x5x1xf32> to vector<4x5x5xf32>
    %15 = arith.mulf %10, %14 : vector<4x5x5xf32>
    %cst_11 = arith.constant dense<0.000000e+00> : vector<4x5x8xf32>
    %16 = tpu.matmul %15, %4, %cst_11 {dimension_numbers = #tpu.dot_dimension_numbers<[2], [1], [1], [2], [0, 0, 0, 1, 1, 2], [0], [0]>} : vector<4x5x5xf32>, vector<4x5x8xf32>, vector<4x5x8xf32> -> vector<4x5x8xf32>
    %c0_12 = arith.constant 0 : index
    %c0_13 = arith.constant 0 : index
    %c0_14 = arith.constant 0 : index
    %17 = vector.load %arg4[%c0_12, %c0_13, %c0_14] : memref<4x5x8xf32, #tpu.memory_space<vmem>>, vector<4x5x8xf32>
    tpu.vector_store %arg4[%c0_12, %c0_13, %c0_14], %16 {strides = array<i32>} : memref<4x5x8xf32, #tpu.memory_space<vmem>>, vector<4x5x8xf32>,
    return
  }
  func.func @transform_0(%arg0: i32) -> (i32, i32, i32) {
    %c0_i32 = arith.constant 0 : i32
    %c0_i32_0 = arith.constant 0 : i32
    %c0_i32_1 = arith.constant 0 : i32
    return %arg0, %c0_i32, %c0_i32_0 : i32, i32, i32
  }
  func.func @transform_1(%arg0: i32) -> (i32, i32, i32) {
    %c0_i32 = arith.constant 0 : i32
    %c0_i32_0 = arith.constant 0 : i32
    %c0_i32_1 = arith.constant 0 : i32
    return %arg0, %c0_i32, %c0_i32_0 : i32, i32, i32
  }
  func.func @transform_2(%arg0: i32) -> (i32, i32, i32) {
    %c0_i32 = arith.constant 0 : i32
    %c0_i32_0 = arith.constant 0 : i32
    %c0_i32_1 = arith.constant 0 : i32
    return %arg0, %c0_i32, %c0_i32_0 : i32, i32, i32
  }
  func.func @transform_3(%arg0: i32) -> (i32, i32, i32) {
    %c0_i32 = arith.constant 0 : i32
    %c0_i32_0 = arith.constant 0 : i32
    %c0_i32_1 = arith.constant 0 : i32
    return %arg0, %c0_i32, %c0_i32_0 : i32, i32, i32
  }
}

module attributes {stable_mosaic.version = 11 : i64} {
  func.func @_linear_kernel(%arg0: i32, %arg1: i32, %arg2: i32, %arg3: memref<16x32xf32, #tpu.memory_space<vmem>>, %arg4: memref<1x32xf32, #tpu.memory_space<vmem>>, %arg5: memref<1x32xf32, #tpu.memory_space<vmem>>, %arg6: memref<32x128xf32, #tpu.memory_space<vmem>>, %arg7: memref<1x128xf32, #tpu.memory_space<vmem>>, %arg8: memref<16x128xf32, #tpu.memory_space<vmem>>) attributes {dimension_semantics = [#tpu.dimension_semantics<parallel>, #tpu.dimension_semantics<parallel>, #tpu.dimension_semantics<arbitrary>], iteration_bounds = array<i64: 1, 1, 1>, scalar_prefetch = 0 : i64, scratch_operands = 0 : i64, tpu.core_type = #tpu.core_type<tc>, window_params = [{transform_indices = @transform_0, window_bounds = array<i64: 16, 32>}, {pipeline_mode = #tpu.pipeline_mode<synchronous>, transform_indices = @transform_1, window_bounds = array<i64: 1, 32>}, {pipeline_mode = #tpu.pipeline_mode<synchronous>, transform_indices = @transform_2, window_bounds = array<i64: 1, 32>}, {transform_indices = @transform_3, window_bounds = array<i64: 32, 128>}, {transform_indices = @transform_4, window_bounds = array<i64: 1, 128>}, {transform_indices = @transform_5, window_bounds = array<i64: 16, 128>}]} {
    %c0 = arith.constant 0 : index
    %c0_0 = arith.constant 0 : index
    %0 = vector.load %arg3[%c0, %c0_0] : memref<16x32xf32, #tpu.memory_space<vmem>>, vector<16x32xf32>
    %cst = arith.constant dense<0.000000e+00> : vector<16xf32>
    %1 = vector.multi_reduction <add>, %0, %cst [1] : vector<16x32xf32> to vector<16xf32>
    %2 = vector.shape_cast %1 : vector<16xf32> to vector<16x1xf32>
    %cst_1 = arith.constant 3.200000e+01 : f32
    %3 = vector.broadcast %cst_1 : f32 to vector<16x1xf32>
    %4 = arith.divf %2, %3 : vector<16x1xf32>
    %5 = vector.broadcast %4 : vector<16x1xf32> to vector<16x32xf32>
    %6 = arith.subf %0, %5 : vector<16x32xf32>
    %7 = arith.mulf %6, %6 : vector<16x32xf32>
    %cst_2 = arith.constant dense<0.000000e+00> : vector<16xf32>
    %8 = vector.multi_reduction <add>, %7, %cst_2 [1] : vector<16x32xf32> to vector<16xf32>
    %9 = vector.shape_cast %8 : vector<16xf32> to vector<16x1xf32>
    %cst_3 = arith.constant 3.200000e+01 : f32
    %10 = vector.broadcast %cst_3 : f32 to vector<16x1xf32>
    %11 = arith.divf %9, %10 : vector<16x1xf32>
    %12 = vector.broadcast %4 : vector<16x1xf32> to vector<16x32xf32>
    %13 = arith.subf %0, %12 : vector<16x32xf32>
    %cst_4 = arith.constant 9.99999974E-6 : f32
    %14 = vector.broadcast %cst_4 : f32 to vector<16x1xf32>
    %15 = arith.addf %11, %14 : vector<16x1xf32>
    %16 = math.rsqrt %15 : vector<16x1xf32>
    %17 = vector.broadcast %16 : vector<16x1xf32> to vector<16x32xf32>
    %18 = arith.mulf %13, %17 : vector<16x32xf32>
    %c0_5 = arith.constant 0 : index
    %c0_6 = arith.constant 0 : index
    %19 = vector.load %arg4[%c0_5, %c0_6] : memref<1x32xf32, #tpu.memory_space<vmem>>, vector<1x32xf32>
    %20 = vector.broadcast %19 : vector<1x32xf32> to vector<16x32xf32>
    %21 = arith.mulf %18, %20 : vector<16x32xf32>
    %c0_7 = arith.constant 0 : index
    %c0_8 = arith.constant 0 : index
    %22 = vector.load %arg5[%c0_7, %c0_8] : memref<1x32xf32, #tpu.memory_space<vmem>>, vector<1x32xf32>
    %23 = vector.broadcast %22 : vector<1x32xf32> to vector<16x32xf32>
    %24 = arith.addf %21, %23 : vector<16x32xf32>
    %c0_9 = arith.constant 0 : index
    %c0_10 = arith.constant 0 : index
    %25 = vector.load %arg6[%c0_9, %c0_10] : memref<32x128xf32, #tpu.memory_space<vmem>>, vector<32x128xf32>
    %cst_11 = arith.constant dense<0.000000e+00> : vector<16x128xf32>
    %26 = tpu.matmul %24, %25, %cst_11 {dimension_numbers = #tpu.dot_dimension_numbers<[1], [0], [0], [1], [0, 0, 1, 1], [], []>} : vector<16x32xf32>, vector<32x128xf32>, vector<16x128xf32> -> vector<16x128xf32>
    %c0_12 = arith.constant 0 : index
    %c0_13 = arith.constant 0 : index
    %27 = vector.load %arg7[%c0_12, %c0_13] : memref<1x128xf32, #tpu.memory_space<vmem>>, vector<1x128xf32>
    %28 = vector.broadcast %27 : vector<1x128xf32> to vector<16x128xf32>
    %29 = arith.addf %26, %28 : vector<16x128xf32>
    %cst_14 = arith.constant 5.000000e-01 : f32
    %30 = vector.broadcast %cst_14 : f32 to vector<16x128xf32>
    %31 = arith.mulf %30, %29 : vector<16x128xf32>
    %cst_15 = arith.constant 0.707106769 : f32
    %32 = vector.broadcast %cst_15 : f32 to vector<16x128xf32>
    %33 = arith.mulf %29, %32 : vector<16x128xf32>
    %34 = math.erf %33 : vector<16x128xf32>
    %cst_16 = arith.constant 1.000000e+00 : f32
    %35 = vector.broadcast %cst_16 : f32 to vector<16x128xf32>
    %36 = arith.addf %35, %34 : vector<16x128xf32>
    %37 = arith.mulf %31, %36 : vector<16x128xf32>
    %c0_17 = arith.constant 0 : index
    %c0_18 = arith.constant 0 : index
    %38 = vector.load %arg8[%c0_17, %c0_18] : memref<16x128xf32, #tpu.memory_space<vmem>>, vector<16x128xf32>
    tpu.vector_store %arg8[%c0_17, %c0_18], %37 {strides = array<i32>} : memref<16x128xf32, #tpu.memory_space<vmem>>, vector<16x128xf32>,
    return
  }
  func.func @transform_0(%arg0: i32, %arg1: i32, %arg2: i32) -> (i32, i32) {
    %c0_i32 = arith.constant 0 : i32
    return %arg0, %arg2 : i32, i32
  }
  func.func @transform_1(%arg0: i32, %arg1: i32, %arg2: i32) -> (i32, i32) {
    %c0_i32 = arith.constant 0 : i32
    %c0_i32_0 = arith.constant 0 : i32
    %c0_i32_1 = arith.constant 0 : i32
    return %c0_i32, %c0_i32_0 : i32, i32
  }
  func.func @transform_2(%arg0: i32, %arg1: i32, %arg2: i32) -> (i32, i32) {
    %c0_i32 = arith.constant 0 : i32
    %c0_i32_0 = arith.constant 0 : i32
    %c0_i32_1 = arith.constant 0 : i32
    return %c0_i32, %c0_i32_0 : i32, i32
  }
  func.func @transform_3(%arg0: i32, %arg1: i32, %arg2: i32) -> (i32, i32) {
    %c0_i32 = arith.constant 0 : i32
    return %arg2, %arg1 : i32, i32
  }
  func.func @transform_4(%arg0: i32, %arg1: i32, %arg2: i32) -> (i32, i32) {
    %c0_i32 = arith.constant 0 : i32
    %c0_i32_0 = arith.constant 0 : i32
    return %c0_i32, %arg1 : i32, i32
  }
  func.func @transform_5(%arg0: i32, %arg1: i32, %arg2: i32) -> (i32, i32) {
    %c0_i32 = arith.constant 0 : i32
    return %arg0, %arg1 : i32, i32
  }
}

module attributes {stable_mosaic.version = 11 : i64} {
  func.func @_linear_kernel(%arg0: i32, %arg1: i32, %arg2: i32, %arg3: memref<16x128xf32, #tpu.memory_space<vmem>>, %arg4: memref<128x128xf32, #tpu.memory_space<vmem>>, %arg5: memref<1x128xf32, #tpu.memory_space<vmem>>, %arg6: memref<16x128xf32, #tpu.memory_space<vmem>>, %arg7: memref<16x128xf32, #tpu.memory_space<vmem>>) attributes {dimension_semantics = [#tpu.dimension_semantics<parallel>, #tpu.dimension_semantics<parallel>, #tpu.dimension_semantics<arbitrary>], iteration_bounds = array<i64: 1, 1, 1>, scalar_prefetch = 0 : i64, scratch_operands = 0 : i64, tpu.core_type = #tpu.core_type<tc>, window_params = [{transform_indices = @transform_0, window_bounds = array<i64: 16, 128>}, {transform_indices = @transform_1, window_bounds = array<i64: 128, 128>}, {transform_indices = @transform_2, window_bounds = array<i64: 1, 128>}, {transform_indices = @transform_3, window_bounds = array<i64: 16, 128>}, {transform_indices = @transform_4, window_bounds = array<i64: 16, 128>}]} {
    %c0 = arith.constant 0 : index
    %c0_0 = arith.constant 0 : index
    %0 = vector.load %arg3[%c0, %c0_0] : memref<16x128xf32, #tpu.memory_space<vmem>>, vector<16x128xf32>
    %c0_1 = arith.constant 0 : index
    %c0_2 = arith.constant 0 : index
    %1 = vector.load %arg4[%c0_1, %c0_2] : memref<128x128xf32, #tpu.memory_space<vmem>>, vector<128x128xf32>
    %cst = arith.constant dense<0.000000e+00> : vector<16x128xf32>
    %2 = tpu.matmul %0, %1, %cst {dimension_numbers = #tpu.dot_dimension_numbers<[1], [0], [0], [1], [0, 0, 1, 1], [], []>} : vector<16x128xf32>, vector<128x128xf32>, vector<16x128xf32> -> vector<16x128xf32>
    %c0_3 = arith.constant 0 : index
    %c0_4 = arith.constant 0 : index
    %3 = vector.load %arg5[%c0_3, %c0_4] : memref<1x128xf32, #tpu.memory_space<vmem>>, vector<1x128xf32>
    %4 = vector.broadcast %3 : vector<1x128xf32> to vector<16x128xf32>
    %5 = arith.addf %2, %4 : vector<16x128xf32>
    %c0_5 = arith.constant 0 : index
    %c0_6 = arith.constant 0 : index
    %6 = vector.load %arg6[%c0_5, %c0_6] : memref<16x128xf32, #tpu.memory_space<vmem>>, vector<16x128xf32>
    %7 = arith.addf %5, %6 : vector<16x128xf32>
    %c0_7 = arith.constant 0 : index
    %c0_8 = arith.constant 0 : index
    %8 = vector.load %arg7[%c0_7, %c0_8] : memref<16x128xf32, #tpu.memory_space<vmem>>, vector<16x128xf32>
    tpu.vector_store %arg7[%c0_7, %c0_8], %7 {strides = array<i32>} : memref<16x128xf32, #tpu.memory_space<vmem>>, vector<16x128xf32>,
    return
  }
  func.func @transform_0(%arg0: i32, %arg1: i32, %arg2: i32) -> (i32, i32) {
    %c0_i32 = arith.constant 0 : i32
    return %arg0, %arg2 : i32, i32
  }
  func.func @transform_1(%arg0: i32, %arg1: i32, %arg2: i32) -> (i32, i32) {
    %c0_i32 = arith.constant 0 : i32
    return %arg2, %arg1 : i32, i32
  }
  func.func @transform_2(%arg0: i32, %arg1: i32, %arg2: i32) -> (i32, i32) {
    %c0_i32 = arith.constant 0 : i32
    %c0_i32_0 = arith.constant 0 : i32
    return %c0_i32, %arg1 : i32, i32
  }
  func.func @transform_3(%arg0: i32, %arg1: i32, %arg2: i32) -> (i32, i32) {
    %c0_i32 = arith.constant 0 : i32
    return %arg0, %arg1 : i32, i32
  }
  func.func @transform_4(%arg0: i32, %arg1: i32, %arg2: i32) -> (i32, i32) {
    %c0_i32 = arith.constant 0 : i32
    return %arg0, %arg1 : i32, i32
  }
}

module attributes {stable_mosaic.version = 11 : i64} {
  func.func @_linear_kernel(%arg0: i32, %arg1: i32, %arg2: i32, %arg3: memref<8x32xf32, #tpu.memory_space<vmem>>, %arg4: memref<1x32xf32, #tpu.memory_space<vmem>>, %arg5: memref<1x32xf32, #tpu.memory_space<vmem>>, %arg6: memref<32x128xf32, #tpu.memory_space<vmem>>, %arg7: memref<1x128xf32, #tpu.memory_space<vmem>>, %arg8: memref<8x128xf32, #tpu.memory_space<vmem>>) attributes {dimension_semantics = [#tpu.dimension_semantics<parallel>, #tpu.dimension_semantics<parallel>, #tpu.dimension_semantics<arbitrary>], iteration_bounds = array<i64: 1, 1, 1>, scalar_prefetch = 0 : i64, scratch_operands = 0 : i64, tpu.core_type = #tpu.core_type<tc>, window_params = [{transform_indices = @transform_0, window_bounds = array<i64: 8, 32>}, {pipeline_mode = #tpu.pipeline_mode<synchronous>, transform_indices = @transform_1, window_bounds = array<i64: 1, 32>}, {pipeline_mode = #tpu.pipeline_mode<synchronous>, transform_indices = @transform_2, window_bounds = array<i64: 1, 32>}, {transform_indices = @transform_3, window_bounds = array<i64: 32, 128>}, {transform_indices = @transform_4, window_bounds = array<i64: 1, 128>}, {transform_indices = @transform_5, window_bounds = array<i64: 8, 128>}]} {
    %c0 = arith.constant 0 : index
    %c0_0 = arith.constant 0 : index
    %0 = vector.load %arg3[%c0, %c0_0] : memref<8x32xf32, #tpu.memory_space<vmem>>, vector<8x32xf32>
    %cst = arith.constant dense<0.000000e+00> : vector<8xf32>
    %1 = vector.multi_reduction <add>, %0, %cst [1] : vector<8x32xf32> to vector<8xf32>
    %2 = vector.shape_cast %1 : vector<8xf32> to vector<8x1xf32>
    %cst_1 = arith.constant 3.200000e+01 : f32
    %3 = vector.broadcast %cst_1 : f32 to vector<8x1xf32>
    %4 = arith.divf %2, %3 : vector<8x1xf32>
    %5 = vector.broadcast %4 : vector<8x1xf32> to vector<8x32xf32>
    %6 = arith.subf %0, %5 : vector<8x32xf32>
    %7 = arith.mulf %6, %6 : vector<8x32xf32>
    %cst_2 = arith.constant dense<0.000000e+00> : vector<8xf32>
    %8 = vector.multi_reduction <add>, %7, %cst_2 [1] : vector<8x32xf32> to vector<8xf32>
    %9 = vector.shape_cast %8 : vector<8xf32> to vector<8x1xf32>
    %cst_3 = arith.constant 3.200000e+01 : f32
    %10 = vector.broadcast %cst_3 : f32 to vector<8x1xf32>
    %11 = arith.divf %9, %10 : vector<8x1xf32>
    %12 = vector.broadcast %4 : vector<8x1xf32> to vector<8x32xf32>
    %13 = arith.subf %0, %12 : vector<8x32xf32>
    %cst_4 = arith.constant 9.99999974E-6 : f32
    %14 = vector.broadcast %cst_4 : f32 to vector<8x1xf32>
    %15 = arith.addf %11, %14 : vector<8x1xf32>
    %16 = math.rsqrt %15 : vector<8x1xf32>
    %17 = vector.broadcast %16 : vector<8x1xf32> to vector<8x32xf32>
    %18 = arith.mulf %13, %17 : vector<8x32xf32>
    %c0_5 = arith.constant 0 : index
    %c0_6 = arith.constant 0 : index
    %19 = vector.load %arg4[%c0_5, %c0_6] : memref<1x32xf32, #tpu.memory_space<vmem>>, vector<1x32xf32>
    %20 = vector.broadcast %19 : vector<1x32xf32> to vector<8x32xf32>
    %21 = arith.mulf %18, %20 : vector<8x32xf32>
    %c0_7 = arith.constant 0 : index
    %c0_8 = arith.constant 0 : index
    %22 = vector.load %arg5[%c0_7, %c0_8] : memref<1x32xf32, #tpu.memory_space<vmem>>, vector<1x32xf32>
    %23 = vector.broadcast %22 : vector<1x32xf32> to vector<8x32xf32>
    %24 = arith.addf %21, %23 : vector<8x32xf32>
    %c0_9 = arith.constant 0 : index
    %c0_10 = arith.constant 0 : index
    %25 = vector.load %arg6[%c0_9, %c0_10] : memref<32x128xf32, #tpu.memory_space<vmem>>, vector<32x128xf32>
    %cst_11 = arith.constant dense<0.000000e+00> : vector<8x128xf32>
    %26 = tpu.matmul %24, %25, %cst_11 {dimension_numbers = #tpu.dot_dimension_numbers<[1], [0], [0], [1], [0, 0, 1, 1], [], []>} : vector<8x32xf32>, vector<32x128xf32>, vector<8x128xf32> -> vector<8x128xf32>
    %c0_12 = arith.constant 0 : index
    %c0_13 = arith.constant 0 : index
    %27 = vector.load %arg7[%c0_12, %c0_13] : memref<1x128xf32, #tpu.memory_space<vmem>>, vector<1x128xf32>
    %28 = vector.broadcast %27 : vector<1x128xf32> to vector<8x128xf32>
    %29 = arith.addf %26, %28 : vector<8x128xf32>
    %c0_14 = arith.constant 0 : index
    %c0_15 = arith.constant 0 : index
    %30 = vector.load %arg8[%c0_14, %c0_15] : memref<8x128xf32, #tpu.memory_space<vmem>>, vector<8x128xf32>
    tpu.vector_store %arg8[%c0_14, %c0_15], %29 {strides = array<i32>} : memref<8x128xf32, #tpu.memory_space<vmem>>, vector<8x128xf32>,
    return
  }
  func.func @transform_0(%arg0: i32, %arg1: i32, %arg2: i32) -> (i32, i32) {
    %c0_i32 = arith.constant 0 : i32
    return %arg0, %arg2 : i32, i32
  }
  func.func @transform_1(%arg0: i32, %arg1: i32, %arg2: i32) -> (i32, i32) {
    %c0_i32 = arith.constant 0 : i32
    %c0_i32_0 = arith.constant 0 : i32
    %c0_i32_1 = arith.constant 0 : i32
    return %c0_i32, %c0_i32_0 : i32, i32
  }
  func.func @transform_2(%arg0: i32, %arg1: i32, %arg2: i32) -> (i32, i32) {
    %c0_i32 = arith.constant 0 : i32
    %c0_i32_0 = arith.constant 0 : i32
    %c0_i32_1 = arith.constant 0 : i32
    return %c0_i32, %c0_i32_0 : i32, i32
  }
  func.func @transform_3(%arg0: i32, %arg1: i32, %arg2: i32) -> (i32, i32) {
    %c0_i32 = arith.constant 0 : i32
    return %arg2, %arg1 : i32, i32
  }
  func.func @transform_4(%arg0: i32, %arg1: i32, %arg2: i32) -> (i32, i32) {
    %c0_i32 = arith.constant 0 : i32
    %c0_i32_0 = arith.constant 0 : i32
    return %c0_i32, %arg1 : i32, i32
  }
  func.func @transform_5(%arg0: i32, %arg1: i32, %arg2: i32) -> (i32, i32) {
    %c0_i32 = arith.constant 0 : i32
    return %arg0, %arg1 : i32, i32
  }
}

</mosaic_0001>

<bundles_post_ra>
// kernel: vit_forward.12
= control target key start
LH: loop header
LB: loop body
LE: loop exit
PB: predicated region body
PF: predicated region fallthrough
CT: control target
= control target key end

     0   :  { %vm28_vm0 = vcmask 523264   ;;  %v209_v4 = vmov 192.0   ;;  %vm150_vm5 = vcmask 261120   ;;  %s363_s0 = inlined_call_operand.vmem [shape: f32[8,192], index: 0, kind: input, shape index: {}]   ;;  %s364_s3 = inlined_call_operand.vmem [shape: f32[192,32], index: 3, kind: input, shape index: {}]   ;;  %s365_s4 = inlined_call_operand.vmem [shape: f32[1,32], index: 4, kind: input, shape index: {}]   ;;  %s366_s1 = inlined_call_operand.vmem [shape: f32[1,192], index: 1, kind: input, shape index: {}]   ;;  %s367_s2 = inlined_call_operand.vmem [shape: f32[1,192], index: 2, kind: input, shape index: {}]   ;;  %s368_s5 = inlined_call_operand.vmem [shape: f32[1,32], index: 5, kind: input, shape index: {}]   ;;  %s369_s6 = inlined_call_operand.vmem [shape: f32[1,32], index: 6, kind: input, shape index: {}]   ;;  %s370_s7 = inlined_call_operand.vmem [shape: f32[8,32], index: 7, kind: output, shape index: {}]  }
   0x1   :  { %v26_v0 = vld [vmem:[%s363_s0] sm:$0xff]  ;;  %v27_v1 = vld [vmem:[%s363_s0 + $0x8] sm:$0xff]  ;;  %201 = vrcp.f32 %v209_v4  ;;  %v94_v5 = vld [vmem:[%s364_s3 + $0x78] sm:$0xff] }
   0x2   :  { %v29_v2 = vsel %vm28_vm0, %v27_v1, 0.0  ;;  %v93_v6 = vld [vmem:[%s364_s3 + $0x70] sm:$0xff]  ;;  %110 = vmatpush.msra.mxu0 %v94_v5  ;;  %v92_v21 = vld [vmem:[%s364_s3 + $0x68] sm:$0xff]  ;;  %v91_v22 = vld [vmem:[%s364_s3 + $0x60] sm:$0xff] }
   0x3   :  { %v30_v3 = vadd.f32 %v29_v2, %v26_v0  ;;  %v90_v23 = vld [vmem:[%s364_s3 + $0x58] sm:$0xff]  ;;  %v89_v24 = vld [vmem:[%s364_s3 + $0x50] sm:$0xff]  ;;  %v88_v25 = vld [vmem:[%s364_s3 + $0x48] sm:$0xff] }
   0x4   :  { %111 = vmatpush.msra.mxu0 %v93_v6  ;;  %v87_v26 = vld [vmem:[%s364_s3 + $0x40] sm:$0xff]  ;;  %v86_v27 = vld [vmem:[%s364_s3 + $0x38] sm:$0xff]  ;;  %v85_v29 = vld [vmem:[%s364_s3 + $0x30] sm:$0xff] }
   0x5   :  { %31 = vadd.xlane.f32.xlu0 %v30_v3  ;;  %v102_v28 = vld [vmem:[%s364_s3 + $0xb8] sm:$0xff]  ;;  %v101_v30 = vld [vmem:[%s364_s3 + $0xb0] sm:$0xff]  ;;  %v84_v31 = vld [vmem:[%s364_s3 + $0x28] sm:$0xff] }
   0x6   :  { %112 = vmatpush.msra.mxu0 %v92_v21  ;;  %138 = vmatpush.msra.mxu1 %v102_v28  ;;  %v100_v32 = vld [vmem:[%s364_s3 + $0xa8] sm:$0xff]  ;;  %v83_v33 = vld [vmem:[%s364_s3 + $0x20] sm:$0xff]  ;;  %v82_v35 = vld [vmem:[%s364_s3 + $0x18] sm:$0xff] }
   0x7   :  { %v202_v7 = vpop.eup %201  ;;  %v99_v34 = vld [vmem:[%s364_s3 + $0xa0] sm:$0xff]  ;;  %v98_v36 = vld [vmem:[%s364_s3 + $0x98] sm:$0xff]  ;;  %v81_v37 = vld [vmem:[%s364_s3 + $0x10] sm:$0xff] }
   0x8   :  { %v34_v8 = vmul.f32 192.0, %v202_v7  ;;  %vm38_vm1 = vweird.f32 %v202_v7  ;;  %113 = vmatpush.msra.mxu0 %v91_v22  ;;  %139 = vmatpush.msra.mxu1 %v101_v30  ;;  %v97_v38 = vld [vmem:[%s364_s3 + $0x90] sm:$0xff]  ;;  %v80_v39 = vld [vmem:[%s364_s3 + $0x8] sm:$0xff]  ;;  %v79_v41 = vld [vmem:[%s364_s3] sm:$0xff] }
   0x9   :  { %v96_v40 = vld [vmem:[%s364_s3 + $0x88] sm:$0xff]  ;;  %v95_v42 = vld [vmem:[%s364_s3 + $0x80] sm:$0xff] }
   0xa   :  { %v35_v9 = vsub.f32 1.0, %v34_v8  ;;  %114 = vmatpush.msra.mxu0 %v90_v23  ;;  %140 = vmatpush.msra.mxu1 %v100_v32  ;;  %v63_v51 = vld [vmem:[%s366_s1] sm:$0x3] }
   0xb   :  { %v71_v53 = vld [vmem:[%s367_s2] sm:$0x3]  ;;  %v65_v54 = vperm.slane %v63_v51, 0  ;;  %v66_v55 = vperm.slane %v63_v51, 1 }
   0xc   :  { %v36_v10 = vmul.f32 %v202_v7, %v35_v9  ;;  %115 = vmatpush.msra.mxu0 %v89_v24  ;;  %141 = vmatpush.msra.mxu1 %v99_v34  ;;  %v73_v59 = vperm.slane %v71_v53, 0  ;;  %v74_v60 = vperm.slane %v71_v53, 1  ;;  %v199_v28 = vld [vmem:[%s368_s5] ss:$0 sm:$0xff] }
   0xd   :  { %v200_v30 = vld [vmem:[%s369_s6] ss:$0 sm:$0xff] }
   0xe   :  { %v37_v11 = vadd.f32 %v202_v7, %v36_v10  ;;  %116 = vmatpush.msra.mxu0 %v88_v25  ;;  %142 = vmatpush.msra.mxu1 %v98_v36 }
  0x10   :  { %v39_v12 = vsel %vm38_vm1, %v202_v7, %v37_v11  ;;  %117 = vmatpush.msra.mxu0 %v87_v26  ;;  %143 = vmatpush.msra.mxu1 %v97_v38  ;;  %v210_v7 = vmov 32.0  }
  0x12   :  { %118 = vmatpush.msra.mxu0 %v86_v27  ;;  %144 = vmatpush.msra.mxu1 %v96_v40 }
  0x14   :  { %119 = vmatpush.msra.mxu0 %v85_v29  ;;  %145 = vmatpush.msra.mxu1 %v95_v42 }
  0x16   :  { %120 = vmatpush.msra.mxu0 %v84_v31 }
  0x18   :  { %121 = vmatpush.msra.mxu0 %v83_v33 }
  0x1a   :  { %122 = vmatpush.msra.mxu0 %v82_v35 }
  0x1c   :  { %123 = vmatpush.msra.mxu0 %v81_v37 }
  0x1e   :  { %124 = vmatpush.msra.mxu0 %v80_v39 }
  0x20   :  { %125 = vmatpush.msra.mxu0 %v79_v41 }
  0x78   :  { %v32_v13 = vpop.xlane.xlu0 %31 }
  0x79   :  { %v40_v14 = vmul.f32 %v39_v12, %v32_v13 }
  0x7b   :  { %v264_v15 = vsub.f32 %v26_v0, %v40_v14  ;;  %v266_v16 = vsub.f32 %v27_v1, %v40_v14  ;;  %v198_v1 = vld [vmem:[%s365_s4] ss:$0 sm:$0xff] }
  0x7d   :  { %v43_v17 = vmul.f32 %v264_v15, %v264_v15  ;;  %v44_v18 = vmul.f32 %v266_v16, %v266_v16 }
  0x7f   :  { %v45_v19 = vsel %vm28_vm0, %v44_v18, 0.0 }
  0x80   :  { %v46_v20 = vadd.f32 %v45_v19, %v43_v17 }
  0x82   :  { %47 = vadd.xlane.f32.xlu0 %v46_v20 }
  0xf5   :  { %v48_v43 = vpop.xlane.xlu0 %47 }
  0xf6   :  { %v49_v44 = vmul.f32 %v48_v43, %v39_v12 }
  0xf8   :  { %v50_v45 = vadd.f32 1e-05, %v49_v44 }
  0xfa   :  { %203 = vrsqrt.f32 %v50_v45  ;;  %vm57_vm3 = vweird.f32 %v50_v45 }
  0xfb   :  { %205 = vrcp.f32 %v210_v7 }
 0x100   :  { %v204_v46 = vpop.eup %203 }
 0x101   :  { %v52_v47 = vmul.f32 %v204_v46, %v50_v45  ;;  %vm58_vm2 = vweird.f32 %v204_v46  ;;  %v206_v8 = vpop.eup %205 }
 0x102   :  { %vm59_vm4 = vmor %vm57_vm3, %vm58_vm2  ;;  %v155_v9 = vmul.f32 32.0, %v206_v8  ;;  %vm159_vm6 = vweird.f32 %v206_v8 }
 0x103   :  { %v53_v48 = vmul.f32 %v204_v46, %v52_v47 }
 0x104   :  { %v156_v10 = vsub.f32 1.0, %v155_v9 }
 0x105   :  { %v54_v49 = vmul.f32 0.5, %v53_v48 }
 0x106   :  { %v157_v11 = vmul.f32 %v206_v8, %v156_v10 }
 0x107   :  { %v55_v50 = vsub.f32 1.5, %v54_v49 }
 0x108   :  { %v158_v12 = vadd.f32 %v206_v8, %v157_v11 }
 0x109   :  { %v56_v52 = vmul.f32 %v204_v46, %v55_v50 }
 0x10a   :  { %v160_v13 = vsel %vm159_vm6, %v206_v8, %v158_v12 }
 0x10b   :  { %v60_v56 = vsel %vm59_vm4, %v204_v46, %v56_v52 }
 0x10c   :  { %v61_v57 = vmul.f32 %v60_v56, %v264_v15  ;;  %v62_v58 = vmul.f32 %v60_v56, %v266_v16 }
 0x10e   :  { %v69_v61 = vmul.f32 %v65_v54, %v61_v57  ;;  %v70_v62 = vmul.f32 %v66_v55, %v62_v58 }
 0x110   :  { %v77_v63 = vadd.f32 %v73_v59, %v69_v61  ;;  %v78_v0 = vadd.f32 %v74_v60, %v70_v62 }
 0x112   :  { %126 = vmatmul.f32.vlgmr.msra.gmra.mxu0 %v77_v63  ;;  %195 = vmatmul.msk.f32.vlgmr.msra.gmra.mxu1 %vm28_vm0, %v78_v0 }
 0x18f   :  { %v127_v2 = vpop.f32.mrf.mxu0  ;;  %v147_v4 = vpop.f32.mrf.mxu1 }
 0x190   :  { %v128_v3 = vadd.f32 %v198_v1, %v127_v2 }
 0x192   :  { %v148_v5 = vadd.f32 %v147_v4, %v128_v3 }
 0x194   :  { %v151_v6 = vsel %vm150_vm5, %v148_v5, 0.0 }
 0x195   :  { %152 = vadd.xlane.f32.xlu1 %v151_v6 }
 0x208   :  { %v153_v14 = vpop.xlane.xlu1 %152 }
 0x209   :  { %v161_v15 = vmul.f32 %v160_v13, %v153_v14 }
 0x20b   :  { %v162_v16 = vsub.f32 %v148_v5, %v161_v15 }
 0x20d   :  { %v163_v17 = vmul.f32 %v162_v16, %v162_v16 }
 0x20f   :  { %v164_v18 = vsel %vm150_vm5, %v163_v17, 0.0 }
 0x210   :  { %165 = vadd.xlane.f32.xlu1 %v164_v18 }
 0x283   :  { %v166_v19 = vpop.xlane.xlu1 %165 }
 0x284   :  { %v167_v20 = vmul.f32 %v166_v19, %v160_v13 }
 0x286   :  { %v168_v21 = vadd.f32 1e-05, %v167_v20 }
 0x288   :  { %207 = vrsqrt.f32 %v168_v21  ;;  %vm175_vm8 = vweird.f32 %v168_v21 }
 0x28e   :  { %v208_v22 = vpop.eup %207 }
 0x28f   :  { %v170_v23 = vmul.f32 %v208_v22, %v168_v21  ;;  %vm176_vm7 = vweird.f32 %v208_v22 }
 0x290   :  { %vm177_vm9 = vmor %vm175_vm8, %vm176_vm7 }
 0x291   :  { %v171_v24 = vmul.f32 %v208_v22, %v170_v23 }
 0x293   :  { %v172_v25 = vmul.f32 0.5, %v171_v24 }
 0x295   :  { %v173_v26 = vsub.f32 1.5, %v172_v25 }
 0x297   :  { %v174_v27 = vmul.f32 %v208_v22, %v173_v26 }
 0x299   :  { %v178_v29 = vsel %vm177_vm9, %v208_v22, %v174_v27 }
 0x29a   :  { %v179_v31 = vmul.f32 %v178_v29, %v162_v16 }
 0x29c   :  { %v184_v32 = vmul.f32 %v199_v28, %v179_v31 }
 0x29e   :  { %v189_v33 = vadd.f32 %v200_v30, %v184_v32 }
 0x2a0   :  { %190 = vst.msk [vmem:[%s370_s7] sm:$0xff] %vm150_vm5, %v189_v33 }

// kernel: vit_forward.13
= control target key start
LH: loop header
LB: loop body
LE: loop exit
PB: predicated region body
PF: predicated region fallthrough
CT: control target
= control target key end

     0   :  { %vm19_vm0 = vcmask 261120   ;;  %v137_v4 = vmov 32.0   ;;  %s199_s0 = inlined_call_operand.vmem [shape: f32[16,32], index: 0, kind: input, shape index: {}]   ;;  %s200_s1 = inlined_call_operand.vmem [shape: f32[1,32], index: 1, kind: input, shape index: {}]   ;;  %s201_s2 = inlined_call_operand.vmem [shape: f32[1,32], index: 2, kind: input, shape index: {}]   ;;  %s202_s3 = inlined_call_operand.vmem [shape: f32[32,128], index: 3, kind: input, shape index: {}]   ;;  %s203_s4 = inlined_call_operand.vmem [shape: f32[16,128], index: 4, kind: output, shape index: {}]  }
   0x1   :  { %v17_v0 = vld [vmem:[%s199_s0] sm:$0xff]  ;;  %v18_v2 = vld [vmem:[%s199_s0 + $0x8] sm:$0xff]  ;;  %131 = vrcp.f32 %v137_v4  ;;  %v86_v21 = vld [vmem:[%s202_s3 + $0x18] sm:$0xff] }
   0x2   :  { %v20_v1 = vsel %vm19_vm0, %v17_v0, 0.0  ;;  %v23_v3 = vsel %vm19_vm0, %v18_v2, 0.0  ;;  %105 = vmatpush.msra.mxu0 %v86_v21  ;;  %124 = vmatpush.msra.mxu1 %v86_v21  ;;  %v85_v22 = vld [vmem:[%s202_s3 + $0x10] sm:$0xff]  ;;  %v84_v23 = vld [vmem:[%s202_s3 + $0x8] sm:$0xff]  ;;  %v83_v24 = vld [vmem:[%s202_s3] sm:$0xff] }
   0x3   :  { %21 = vadd.xlane.f32.xlu0 %v20_v1  ;;  %v129_v39 = vld [vmem:[%s200_s1] ss:$0 sm:$0xff] }
   0x4   :  { %106 = vmatpush.msra.mxu0 %v85_v22  ;;  %125 = vmatpush.msra.mxu1 %v85_v22  ;;  %v130_v43 = vld [vmem:[%s201_s2] ss:$0 sm:$0xff] }
   0x6   :  { %107 = vmatpush.msra.mxu0 %v84_v23  ;;  %126 = vmatpush.msra.mxu1 %v84_v23 }
   0x7   :  { %v132_v5 = vpop.eup %131 }
   0x8   :  { %v27_v6 = vmul.f32 32.0, %v132_v5  ;;  %vm31_vm1 = vweird.f32 %v132_v5  ;;  %108 = vmatpush.msra.mxu0 %v83_v24  ;;  %127 = vmatpush.msra.mxu1 %v83_v24 }
   0xa   :  { %v28_v7 = vsub.f32 1.0, %v27_v6 }
   0xb   :  { %24 = vadd.xlane.f32.xlu0 %v23_v3 }
   0xc   :  { %v29_v8 = vmul.f32 %v132_v5, %v28_v7 }
   0xe   :  { %v30_v9 = vadd.f32 %v132_v5, %v29_v8 }
  0x10   :  { %v32_v10 = vsel %vm31_vm1, %v132_v5, %v30_v9 }
  0x76   :  { %v22_v11 = vpop.xlane.xlu0 %21 }
  0x77   :  { %v33_v12 = vmul.f32 %v32_v10, %v22_v11 }
  0x79   :  { %v35_v13 = vsub.f32 %v17_v0, %v33_v12 }
  0x7b   :  { %v37_v14 = vmul.f32 %v35_v13, %v35_v13 }
  0x7d   :  { %v39_v15 = vsel %vm19_vm0, %v37_v14, 0.0 }
  0x7e   :  { %40 = vadd.xlane.f32.xlu1 %v39_v15  ;;  %v25_v16 = vpop.xlane.xlu0 %24 }
  0x7f   :  { %v34_v17 = vmul.f32 %v32_v10, %v25_v16 }
  0x81   :  { %v36_v18 = vsub.f32 %v18_v2, %v34_v17 }
  0x83   :  { %v38_v19 = vmul.f32 %v36_v18, %v36_v18 }
  0x85   :  { %v42_v20 = vsel %vm19_vm0, %v38_v19, 0.0 }
  0x86   :  { %43 = vadd.xlane.f32.xlu1 %v42_v20 }
  0xf1   :  { %v41_v25 = vpop.xlane.xlu1 %40 }
  0xf2   :  { %v45_v26 = vmul.f32 %v41_v25, %v32_v10 }
  0xf4   :  { %v47_v27 = vadd.f32 1e-05, %v45_v26 }
  0xf6   :  { %133 = vrsqrt.f32 %v47_v27  ;;  %vm55_vm3 = vweird.f32 %v47_v27 }
  0xf9   :  { %v44_v28 = vpop.xlane.xlu1 %43 }
  0xfa   :  { %v46_v29 = vmul.f32 %v44_v28, %v32_v10 }
  0xfc   :  { %v134_v30 = vpop.eup %133  ;;  %v48_v31 = vadd.f32 1e-05, %v46_v29 }
  0xfd   :  { %v50_v32 = vmul.f32 %v134_v30, %v47_v27  ;;  %vm56_vm2 = vweird.f32 %v134_v30 }
  0xfe   :  { %135 = vrsqrt.f32 %v48_v31  ;;  %vm57_vm4 = vmor %vm55_vm3, %vm56_vm2  ;;  %vm65_vm6 = vweird.f32 %v48_v31 }
  0xff   :  { %v51_v33 = vmul.f32 %v134_v30, %v50_v32 }
 0x101   :  { %v52_v34 = vmul.f32 0.5, %v51_v33 }
 0x103   :  { %v53_v35 = vsub.f32 1.5, %v52_v34 }
 0x104   :  { %v136_v36 = vpop.eup %135 }
 0x105   :  { %v54_v37 = vmul.f32 %v134_v30, %v53_v35  ;;  %v60_v38 = vmul.f32 %v136_v36, %v48_v31  ;;  %vm66_vm5 = vweird.f32 %v136_v36 }
 0x106   :  { %vm67_vm7 = vmor %vm65_vm6, %vm66_vm5 }
 0x107   :  { %v58_v40 = vsel %vm57_vm4, %v134_v30, %v54_v37  ;;  %v61_v41 = vmul.f32 %v136_v36, %v60_v38 }
 0x108   :  { %v69_v42 = vmul.f32 %v58_v40, %v35_v13 }
 0x109   :  { %v62_v44 = vmul.f32 0.5, %v61_v41 }
 0x10a   :  { %v75_v45 = vmul.f32 %v129_v39, %v69_v42 }
 0x10b   :  { %v63_v46 = vsub.f32 1.5, %v62_v44 }
 0x10c   :  { %v81_v47 = vadd.f32 %v130_v43, %v75_v45 }
 0x10d   :  { %v64_v48 = vmul.f32 %v136_v36, %v63_v46 }
 0x10e   :  { %122 = vmatmul.msk.f32.vlgmr.msra.gmra.mxu0 %vm19_vm0, %v81_v47 }
 0x10f   :  { %v68_v49 = vsel %vm67_vm7, %v136_v36, %v64_v48 }
 0x110   :  { %v70_v50 = vmul.f32 %v68_v49, %v36_v18 }
 0x112   :  { %v76_v51 = vmul.f32 %v129_v39, %v70_v50 }
 0x114   :  { %v82_v52 = vadd.f32 %v130_v43, %v76_v51 }
 0x116   :  { %123 = vmatmul.msk.f32.vlgmr.msra.gmra.mxu1 %vm19_vm0, %v82_v52 }
 0x18b   :  { %v110_v53 = vpop.f32.mrf.mxu0 }
 0x18c   :  { %116 = vst [vmem:[%s203_s4] sm:$0xff] %v110_v53 }
 0x193   :  { %v113_v54 = vpop.f32.mrf.mxu1 }
 0x194   :  { %117 = vst [vmem:[%s203_s4 + $0x8] sm:$0xff] %v113_v54 }

// kernel: vit_forward.14
= control target key start
LH: loop header
LB: loop body
LE: loop exit
PB: predicated region body
PF: predicated region fallthrough
CT: control target
= control target key end

     0   :  { %s658_s12 = smov 0   ;;  %s703_s0 = inlined_call_operand.vmem [shape: f32[8,5,8], index: 0, kind: input, shape index: {}]   ;;  %s704_s1 = inlined_call_operand.vmem [shape: f32[8,5,8], index: 1, kind: input, shape index: {}]   ;;  %s705_s2 = inlined_call_operand.vmem [shape: f32[8,5,8], index: 2, kind: input, shape index: {}]   ;;  %s706_s3 = inlined_call_operand.vmem [shape: f32[8,5,8], index: 3, kind: output, shape index: {}]  }
   0x1 LB: > { %s575_s13 = sadd.s32 4294967295, %s636_s12   ;;  %p579_p0 = scmp.ge.s32.totalorder %s636_s12, 1  ;;  %s636_s12 = sphi %s658_s12, %s13_s12  }
   0x2   : > { %p160_p1 = scmp.lt.s32.totalorder %s636_s12, 3 }
   0x4   : > { %p161_p2 = pnand %p579_p0, %p160_p1 }
   0x5   : > { %s580_s14 = sshll.u32 (!%p161_p2), %s575_s13, 2 }
   0x6   : > { %164 = sbr.rel (%p161_p2) target bundleno = 545 (0x221), region = 32  ;;  %p195_p3 = scmp.lt.s32.totalorder (!%p161_p2), %s580_s14, 7 }
   0xb   : > { %s708_s14 = smov (!%p195_p3, %s580_s14), 7  ;;  %vm234_vm0 = vcmask 64512   ;;  %vm339_vm1 = vcmask 36864   ;;  %vm388_vm2 = vcmask 1044480   ;;  %vm384_vm3 = vcmask 39936  }
   0xc   : > { %s666_s15 = sshll.u32 %s708_s14, 3  ;;  %vm490_vm4 = vcmask 61440  }
   0xd   : > { %s204_s18 = scalar_lea.vmem %s704_s1, %s666_s15  ;;  %s198_s21 = scalar_lea.vmem %s703_s0, %s666_s15 }
   0xe   : > { %v226_v0 = vld [vmem:[%s204_s18] sm:$0x1f]  ;;  %v228_v1 = vld [vmem:[%s204_s18 + $0x10] sm:$0x1f]  ;;  %v227_v5 = vld [vmem:[%s204_s18 + $0x8] sm:$0x1f]  ;;  %s210_s24 = scalar_lea.vmem %s705_s2, %s666_s15  ;;  %s216_s27 = scalar_lea.vmem %s706_s3, %s666_s15 }
   0xf   : > { %v218_v2 = vld [vmem:[%s198_s21] sm:$0x1f]  ;;  %588 = vmatpush.xpose.msk.msra.mxu0 %vm234_vm0, %v226_v0  ;;  %592 = vmatpush.xpose.msk.msra.mxu2 %vm234_vm0, %v228_v1  ;;  %v220_v4 = vld [vmem:[%s198_s21 + $0x10] sm:$0x1f]  ;;  %v229_v7 = vld [vmem:[%s204_s18 + $0x18] sm:$0x1f] }
  0x10   : > { %v222_v3 = vmul.f32 0.35355338, %v218_v2  ;;  %v224_v6 = vmul.f32 0.35355338, %v220_v4  ;;  %590 = vmatpush.xpose.msk.msra.mxu1 %vm234_vm0, %v227_v5  ;;  %v219_v8 = vld [vmem:[%s198_s21 + $0x8] sm:$0x1f]  ;;  %594 = vmatpush.xpose.msk.msra.mxu3 %vm234_vm0, %v229_v7 }
  0x11   : > { %v223_v9 = vmul.f32 0.35355338, %v219_v8  ;;  %v221_v10 = vld [vmem:[%s198_s21 + $0x18] sm:$0x1f]  ;;  %v230_v40 = vld [vmem:[%s210_s24] sm:$0x1f] }
  0x12   : > { %589 = vmatmul.msk.f32.vlgmr.msra.gmra.mxu0 %vm234_vm0, %v222_v3  ;;  %593 = vmatmul.msk.f32.vlgmr.msra.gmra.mxu2 %vm234_vm0, %v224_v6  ;;  %v225_v11 = vmul.f32 0.35355338, %v221_v10  ;;  %v232_v41 = vld [vmem:[%s210_s24 + $0x10] sm:$0x1f]  ;;  %v231_v42 = vld [vmem:[%s210_s24 + $0x8] sm:$0x1f] }
  0x13   : > { %591 = vmatmul.msk.f32.vlgmr.msra.gmra.mxu1 %vm234_vm0, %v223_v9  ;;  %596 = vmatpush.msk.msrb.mxu0 %vm388_vm2, %v230_v40  ;;  %v233_v43 = vld [vmem:[%s210_s24 + $0x18] sm:$0x1f] }
  0x14   : > { %595 = vmatmul.msk.f32.vlgmr.msra.gmra.mxu3 %vm234_vm0, %v225_v11  ;;  %600 = vmatpush.msk.msrb.mxu2 %vm388_vm2, %v232_v41 }
  0x15   : > { %598 = vmatpush.msk.msrb.mxu1 %vm388_vm2, %v231_v42  ;;  %602 = vmatpush.msk.msrb.mxu3 %vm388_vm2, %v233_v43 }
  0x8f   : > { %v258_v12 = vpop.f32.mrf.mxu0 }
  0x90   : > { %v340_v13 = vsel %vm339_vm1, %v258_v12, -inf  ;;  %v284_v14 = vpop.f32.mrf.mxu1 }
  0x91   : > { %341 = vmax.xlane.f32.xlu1 %v340_v13  ;;  %v343_v17 = vsel %vm339_vm1, %v284_v14, -inf }
  0x95   : > { %v310_v15 = vpop.f32.mrf.mxu2 }
  0x96   : > { %v346_v16 = vsel %vm339_vm1, %v310_v15, -inf }
  0x97   : > { %347 = vmax.xlane.f32.xlu0 %v346_v16  ;;  %v336_v18 = vpop.f32.mrf.mxu3 }
  0x98   : > { %v349_v19 = vsel %vm339_vm1, %v336_v18, -inf }
  0x99   : > { %344 = vmax.xlane.f32.xlu1 %v343_v17 }
  0x9f   : > { %350 = vmax.xlane.f32.xlu0 %v349_v19 }
 0x104   : > { %v342_v20 = vpop.xlane.xlu1 %341 }
 0x105   : > { %v352_v21 = vsub.f32 %v258_v12, %v342_v20 }
 0x107   : > { %v356_v22 = vmul.f32 1.442695, %v352_v21 }
 0x109   : > { %614 = vpow2.f32 %v356_v22 }
 0x10a   : > { %v348_v23 = vpop.xlane.xlu0 %347 }
 0x10b   : > { %v354_v24 = vsub.f32 %v310_v15, %v348_v23 }
 0x10c   : > { %v345_v25 = vpop.xlane.xlu1 %344 }
 0x10d   : > { %v360_v26 = vmul.f32 1.442695, %v354_v24  ;;  %v353_v27 = vsub.f32 %v284_v14, %v345_v25 }
 0x10f   : > { %v615_v28 = vpop.eup %614  ;;  %616 = vpow2.f32 %v360_v26  ;;  %v358_v29 = vmul.f32 1.442695, %v353_v27 }
 0x110   : > { %v364_v30 = vsel %vm339_vm1, %v615_v28, 0.0 }
 0x111   : > { %618 = vpow2.f32 %v358_v29  ;;  %365 = vadd.xlane.f32.xlu0 %v364_v30 }
 0x112   : > { %v351_v31 = vpop.xlane.xlu0 %350 }
 0x113   : > { %v355_v32 = vsub.f32 %v336_v18, %v351_v31 }
 0x115   : > { %v617_v33 = vpop.eup %616  ;;  %v362_v34 = vmul.f32 1.442695, %v355_v32 }
 0x116   : > { %v370_v35 = vsel %vm339_vm1, %v617_v33, 0.0 }
 0x117   : > { %v619_v36 = vpop.eup %618  ;;  %620 = vpow2.f32 %v362_v34  ;;  %371 = vadd.xlane.f32.xlu2 %v370_v35 }
 0x118   : > { %v367_v37 = vsel %vm339_vm1, %v619_v36, 0.0 }
 0x119   : > { %368 = vadd.xlane.f32.xlu1 %v367_v37 }
 0x11d   : > { %v621_v38 = vpop.eup %620 }
 0x11e   : > { %v373_v39 = vsel %vm339_vm1, %v621_v38, 0.0 }
 0x11f   : > { %374 = vadd.xlane.f32.xlu2 %v373_v39 }
 0x184   : > { %v366_v44 = vpop.xlane.xlu0 %365 }
 0x185   : > { %622 = vrcp.f32 %v366_v44 }
 0x18a   : > { %v372_v45 = vpop.xlane.xlu2 %371 }
 0x18b   : > { %v623_v46 = vpop.eup %622  ;;  %624 = vrcp.f32 %v372_v45 }
 0x18c   : > { %v380_v47 = vmul.f32 %v623_v46, %v615_v28  ;;  %v369_v48 = vpop.xlane.xlu1 %368 }
 0x18d   : > { %626 = vrcp.f32 %v369_v48 }
 0x18e   : > { %597 = vmatmul.msk.f32.vlgmr.msrb.gmra.mxu0 %vm384_vm3, %v380_v47 }
 0x191   : > { %v625_v49 = vpop.eup %624 }
 0x192   : > { %v375_v50 = vpop.xlane.xlu2 %374  ;;  %v382_v51 = vmul.f32 %v625_v49, %v617_v33 }
 0x193   : > { %v627_v52 = vpop.eup %626  ;;  %628 = vrcp.f32 %v375_v50 }
 0x194   : > { %v381_v53 = vmul.f32 %v627_v52, %v619_v36  ;;  %601 = vmatmul.msk.f32.vlgmr.msrb.gmra.mxu2 %vm384_vm3, %v382_v51 }
 0x196   : > { %599 = vmatmul.msk.f32.vlgmr.msrb.gmra.mxu1 %vm384_vm3, %v381_v53 }
 0x199   : > { %v629_v54 = vpop.eup %628 }
 0x19a   : > { %v383_v55 = vmul.f32 %v629_v54, %v621_v38 }
 0x19c   : > { %603 = vmatmul.msk.f32.vlgmr.msrb.gmra.mxu3 %vm384_vm3, %v383_v55 }
 0x20b   : > { %v409_v56 = vpop.f32.mrf.mxu0 }
 0x20c   : > { %491 = vst.msk [vmem:[%s216_s27] sm:$0x1f] %vm490_vm4, %v409_v56 }
 0x213   : > { %v435_v57 = vpop.f32.mrf.mxu1 }
 0x214   : > { %492 = vst.msk [vmem:[%s216_s27 + $0x8] sm:$0x1f] %vm490_vm4, %v435_v57 }
 0x217   : > { %v461_v58 = vpop.f32.mrf.mxu2 }
 0x218   : > { %493 = vst.msk [vmem:[%s216_s27 + $0x10] sm:$0x1f] %vm490_vm4, %v461_v58 }
 0x21f   : > { %v487_v59 = vpop.f32.mrf.mxu3 }
 0x220   : > { %494 = vst.msk [vmem:[%s216_s27 + $0x18] sm:$0x1f] %vm490_vm4, %v487_v59 }
 0x221 PF: > { %s13_s12 = sadd.s32 1, %s636_s12  }
 0x222   : > { %p10_p4 = scmp.ge.s32.totalorder %s13_s12, 4  }
 0x224   :  { %12 = sbr.rel (!%p10_p4) target bundleno = 1 (0x1), region = 68 }

// kernel: vit_forward.16
= control target key start
LH: loop header
LB: loop body
LE: loop exit
PB: predicated region body
PF: predicated region fallthrough
CT: control target
= control target key end

     0   :  { %vm22_vm0 = vcmask 261120   ;;  %v239_v4 = vmov 32.0   ;;  %s322_s0 = inlined_call_operand.vmem [shape: f32[16,32], index: 0, kind: input, shape index: {}]   ;;  %s323_s1 = inlined_call_operand.vmem [shape: f32[1,32], index: 1, kind: input, shape index: {}]   ;;  %s324_s2 = inlined_call_operand.vmem [shape: f32[1,32], index: 2, kind: input, shape index: {}]   ;;  %s325_s4 = inlined_call_operand.vmem [shape: f32[1,128], index: 4, kind: input, shape index: {}]   ;;  %s326_s3 = inlined_call_operand.vmem [shape: f32[32,128], index: 3, kind: input, shape index: {}]   ;;  %s327_s5 = inlined_call_operand.vmem [shape: f32[16,128], index: 5, kind: output, shape index: {}]  }
   0x1   :  { %v20_v0 = vld [vmem:[%s322_s0] sm:$0xff]  ;;  %v21_v2 = vld [vmem:[%s322_s0 + $0x8] sm:$0xff]  ;;  %229 = vrcp.f32 %v239_v4  ;;  %v89_v21 = vld [vmem:[%s326_s3 + $0x18] sm:$0xff] }
   0x2   :  { %v23_v1 = vsel %vm22_vm0, %v20_v0, 0.0  ;;  %v26_v3 = vsel %vm22_vm0, %v21_v2, 0.0  ;;  %112 = vmatpush.msra.mxu0 %v89_v21  ;;  %221 = vmatpush.msra.mxu1 %v89_v21  ;;  %v88_v22 = vld [vmem:[%s326_s3 + $0x10] sm:$0xff]  ;;  %v87_v23 = vld [vmem:[%s326_s3 + $0x8] sm:$0xff]  ;;  %v86_v24 = vld [vmem:[%s326_s3] sm:$0xff] }
   0x3   :  { %24 = vadd.xlane.f32.xlu0 %v23_v1  ;;  %v226_v39 = vld [vmem:[%s323_s1] ss:$0 sm:$0xff] }
   0x4   :  { %113 = vmatpush.msra.mxu0 %v88_v22  ;;  %222 = vmatpush.msra.mxu1 %v88_v22  ;;  %v227_v43 = vld [vmem:[%s324_s2] ss:$0 sm:$0xff] }
   0x5   :  { %v228_v53 = vld [vmem:[%s325_s4] ss:$0 sm:$0xff] }
   0x6   :  { %114 = vmatpush.msra.mxu0 %v87_v23  ;;  %223 = vmatpush.msra.mxu1 %v87_v23 }
   0x7   :  { %v230_v5 = vpop.eup %229 }
   0x8   :  { %v30_v6 = vmul.f32 32.0, %v230_v5  ;;  %vm34_vm1 = vweird.f32 %v230_v5  ;;  %115 = vmatpush.msra.mxu0 %v86_v24  ;;  %224 = vmatpush.msra.mxu1 %v86_v24 }
   0xa   :  { %v31_v7 = vsub.f32 1.0, %v30_v6 }
   0xb   :  { %27 = vadd.xlane.f32.xlu0 %v26_v3 }
   0xc   :  { %v32_v8 = vmul.f32 %v230_v5, %v31_v7 }
   0xe   :  { %v33_v9 = vadd.f32 %v230_v5, %v32_v8 }
  0x10   :  { %v35_v10 = vsel %vm34_vm1, %v230_v5, %v33_v9 }
  0x76   :  { %v25_v11 = vpop.xlane.xlu0 %24 }
  0x77   :  { %v36_v12 = vmul.f32 %v35_v10, %v25_v11 }
  0x79   :  { %v38_v13 = vsub.f32 %v20_v0, %v36_v12 }
  0x7b   :  { %v40_v14 = vmul.f32 %v38_v13, %v38_v13 }
  0x7d   :  { %v42_v15 = vsel %vm22_vm0, %v40_v14, 0.0 }
  0x7e   :  { %43 = vadd.xlane.f32.xlu1 %v42_v15  ;;  %v28_v16 = vpop.xlane.xlu0 %27 }
  0x7f   :  { %v37_v17 = vmul.f32 %v35_v10, %v28_v16 }
  0x81   :  { %v39_v18 = vsub.f32 %v21_v2, %v37_v17 }
  0x83   :  { %v41_v19 = vmul.f32 %v39_v18, %v39_v18 }
  0x85   :  { %v45_v20 = vsel %vm22_vm0, %v41_v19, 0.0 }
  0x86   :  { %46 = vadd.xlane.f32.xlu1 %v45_v20 }
  0xf1   :  { %v44_v25 = vpop.xlane.xlu1 %43 }
  0xf2   :  { %v48_v26 = vmul.f32 %v44_v25, %v35_v10 }
  0xf4   :  { %v50_v27 = vadd.f32 1e-05, %v48_v26 }
  0xf6   :  { %231 = vrsqrt.f32 %v50_v27  ;;  %vm58_vm3 = vweird.f32 %v50_v27 }
  0xf9   :  { %v47_v28 = vpop.xlane.xlu1 %46 }
  0xfa   :  { %v49_v29 = vmul.f32 %v47_v28, %v35_v10 }
  0xfc   :  { %v232_v30 = vpop.eup %231  ;;  %v51_v31 = vadd.f32 1e-05, %v49_v29 }
  0xfd   :  { %v53_v32 = vmul.f32 %v232_v30, %v50_v27  ;;  %vm59_vm2 = vweird.f32 %v232_v30 }
  0xfe   :  { %233 = vrsqrt.f32 %v51_v31  ;;  %vm60_vm4 = vmor %vm58_vm3, %vm59_vm2  ;;  %vm68_vm6 = vweird.f32 %v51_v31 }
  0xff   :  { %v54_v33 = vmul.f32 %v232_v30, %v53_v32 }
 0x101   :  { %v55_v34 = vmul.f32 0.5, %v54_v33 }
 0x103   :  { %v56_v35 = vsub.f32 1.5, %v55_v34 }
 0x104   :  { %v234_v36 = vpop.eup %233 }
 0x105   :  { %v57_v37 = vmul.f32 %v232_v30, %v56_v35  ;;  %v63_v38 = vmul.f32 %v234_v36, %v51_v31  ;;  %vm69_vm5 = vweird.f32 %v234_v36 }
 0x106   :  { %vm70_vm7 = vmor %vm68_vm6, %vm69_vm5 }
 0x107   :  { %v61_v40 = vsel %vm60_vm4, %v232_v30, %v57_v37  ;;  %v64_v41 = vmul.f32 %v234_v36, %v63_v38 }
 0x108   :  { %v72_v42 = vmul.f32 %v61_v40, %v38_v13 }
 0x109   :  { %v65_v44 = vmul.f32 0.5, %v64_v41 }
 0x10a   :  { %v78_v45 = vmul.f32 %v226_v39, %v72_v42 }
 0x10b   :  { %v66_v46 = vsub.f32 1.5, %v65_v44 }
 0x10c   :  { %v84_v47 = vadd.f32 %v227_v43, %v78_v45 }
 0x10d   :  { %v67_v48 = vmul.f32 %v234_v36, %v66_v46 }
 0x10e   :  { %217 = vmatmul.msk.f32.vlgmr.msra.gmra.mxu0 %vm22_vm0, %v84_v47 }
 0x10f   :  { %v71_v49 = vsel %vm70_vm7, %v234_v36, %v67_v48 }
 0x110   :  { %v73_v50 = vmul.f32 %v71_v49, %v39_v18 }
 0x112   :  { %v79_v51 = vmul.f32 %v226_v39, %v73_v50 }
 0x114   :  { %v85_v52 = vadd.f32 %v227_v43, %v79_v51 }
 0x116   :  { %218 = vmatmul.msk.f32.vlgmr.msra.gmra.mxu1 %vm22_vm0, %v85_v52 }
 0x18b   :  { %v117_v54 = vpop.f32.mrf.mxu0 }
 0x18c   :  { %v303_v55 = vadd.f32 %v228_v53, %v117_v54 }
 0x18e   :  { %v125_v56 = vmul.f32 0.70710677, %v303_v55 }
 0x190   :  { %v127_v57 = vmul.f32 %v125_v56, %v125_v56 }
 0x192   :  { %v128_v58 = vmin.f32 %v127_v57, 16.0 }
 0x193   :  { %v120_v59 = vpop.f32.mrf.mxu1 }
 0x194   :  { %v129_v60 = vmul.f32 2.1237322e-06, %v128_v58  ;;  %v140_v61 = vmul.f32 3.8918573e-05, %v128_v58  ;;  %v306_v62 = vadd.f32 %v228_v53, %v120_v59 }
 0x196   :  { %v130_v63 = vadd.f32 0.00028619796, %v129_v60  ;;  %v141_v0 = vadd.f32 0.001143296, %v140_v61  ;;  %v309_v1 = vmul.f32 0.70710677, %v306_v62 }
 0x197   :  { %v123_v61 = vmul.f32 0.5, %v303_v55 }
 0x198   :  { %v131_v2 = vmul.f32 %v130_v63, %v128_v58  ;;  %v142_v3 = vmul.f32 %v141_v0, %v128_v58  ;;  %v167_v4 = vmul.f32 %v309_v1, %v309_v1 }
 0x19a   :  { %v143_v5 = vadd.f32 0.014752088, %v142_v3  ;;  %v132_v6 = vadd.f32 0.0036580483, %v131_v2  ;;  %v168_v7 = vmin.f32 %v167_v4, 16.0 }
 0x19c   :  { %v144_v8 = vmul.f32 %v143_v5, %v128_v58  ;;  %v169_v9 = vmul.f32 2.1237322e-06, %v168_v7  ;;  %v180_v10 = vmul.f32 3.8918573e-05, %v168_v7  ;;  %v133_v12 = vmul.f32 %v132_v6, %v128_v58 }
 0x19e   :  { %v145_v11 = vadd.f32 0.112945676, %v144_v8  ;;  %v170_v13 = vadd.f32 0.00028619796, %v169_v9  ;;  %v181_v14 = vadd.f32 0.001143296, %v180_v10 }
 0x19f   :  { %v134_v19 = vadd.f32 0.05243302, %v133_v12  ;;  %v124_v8 = vmul.f32 0.5, %v306_v62 }
 0x1a0   :  { %v146_v15 = vmul.f32 %v145_v11, %v128_v58  ;;  %v171_v16 = vmul.f32 %v170_v13, %v168_v7  ;;  %v182_v17 = vmul.f32 %v181_v14, %v168_v7 }
 0x1a1   :  { %v135_v25 = vmul.f32 %v134_v19, %v128_v58 }
 0x1a2   :  { %v147_v18 = vadd.f32 0.4994258, %v146_v15  ;;  %v183_v20 = vadd.f32 0.014752088, %v182_v17  ;;  %v172_v22 = vadd.f32 0.0036580483, %v171_v16 }
 0x1a3   :  { %v136_v29 = vadd.f32 0.18741608, %v135_v25 }
 0x1a4   :  { %v148_v21 = vmul.f32 %v147_v18, %v128_v58  ;;  %v184_v23 = vmul.f32 %v183_v20, %v168_v7  ;;  %v173_v27 = vmul.f32 %v172_v22, %v168_v7 }
 0x1a5   :  { %v137_v34 = vmul.f32 %v136_v29, %v128_v58 }
 0x1a6   :  { %v149_v24 = vadd.f32 1.0, %v148_v21  ;;  %v185_v26 = vadd.f32 0.112945676, %v184_v23  ;;  %v174_v31 = vadd.f32 0.05243302, %v173_v27 }
 0x1a7   :  { %v138_v40 = vadd.f32 1.1283791, %v137_v34 }
 0x1a8   :  { %235 = vrcp.f32 %v149_v24  ;;  %v186_v28 = vmul.f32 %v185_v26, %v168_v7  ;;  %v175_v37 = vmul.f32 %v174_v31, %v168_v7  ;;  %v161_v39 = vand.u32 2147483648, %v149_v24 }
 0x1a9   :  { %v159_v42 = vand.u32 2147483647, %v149_v24  ;;  %vm155_vm9 = vweird.f32 %v149_v24  ;;  %v139_v47 = vmul.f32 %v138_v40, %v125_v56 }
 0x1aa   :  { %v187_v30 = vadd.f32 0.4994258, %v186_v28  ;;  %v176_v43 = vadd.f32 0.18741608, %v175_v37  ;;  %v162_v45 = vor.u32 1.1754944e-38, %v161_v39 }
 0x1ab   :  { %vm160_vm11 = vcmp.eq.f32.partialorder %v159_v42, 8.507059e+37 }
 0x1ac   :  { %v188_v32 = vmul.f32 %v187_v30, %v168_v7  ;;  %v177_v50 = vmul.f32 %v176_v43, %v168_v7 }
 0x1ae   :  { %v236_v33 = vpop.eup %235  ;;  %v189_v36 = vadd.f32 1.0, %v188_v32  ;;  %v178_v58 = vadd.f32 1.1283791, %v177_v50 }
 0x1af   :  { %v151_v35 = vmul.f32 %v236_v33, %v149_v24  ;;  %vm156_vm8 = vweird.f32 %v236_v33 }
 0x1b0   :  { %237 = vrcp.f32 %v189_v36  ;;  %vm157_vm10 = vmor %vm155_vm9, %vm156_vm8  ;;  %v201_v57 = vand.u32 2147483648, %v189_v36  ;;  %v199_v60 = vand.u32 2147483647, %v189_v36  ;;  %vm195_vm13 = vweird.f32 %v189_v36 }
 0x1b1   :  { %v152_v38 = vsub.f32 1.0, %v151_v35  ;;  %v179_v3 = vmul.f32 %v178_v58, %v309_v1 }
 0x1b2   :  { %v202_v56 = vor.u32 1.1754944e-38, %v201_v57  ;;  %vm200_vm15 = vcmp.eq.f32.partialorder %v199_v60, 8.507059e+37 }
 0x1b3   :  { %v153_v41 = vmul.f32 %v236_v33, %v152_v38 }
 0x1b5   :  { %v154_v44 = vadd.f32 %v236_v33, %v153_v41 }
 0x1b6   :  { %v238_v46 = vpop.eup %237 }
 0x1b7   :  { %v158_v48 = vsel %vm157_vm10, %v236_v33, %v154_v44  ;;  %v191_v51 = vmul.f32 %v238_v46, %v189_v36  ;;  %vm196_vm12 = vweird.f32 %v238_v46 }
 0x1b8   :  { %v163_v49 = vsel %vm160_vm11, %v162_v45, %v158_v48  ;;  %vm197_vm14 = vmor %vm195_vm13, %vm196_vm12 }
 0x1b9   :  { %v164_v52 = vmul.f32 %v163_v49, %v139_v47  ;;  %v192_v53 = vsub.f32 1.0, %v191_v51 }
 0x1bb   :  { %v219_v54 = vclamps-f32 %v164_v52, 1.0  ;;  %v193_v59 = vmul.f32 %v238_v46, %v192_v53 }
 0x1bd   :  { %v207_v63 = vadd.f32 1.0, %v219_v54  ;;  %v194_v0 = vadd.f32 %v238_v46, %v193_v59 }
 0x1bf   :  { %v209_v2 = vmul.f32 %v207_v63, %v123_v61  ;;  %v198_v4 = vsel %vm197_vm14, %v238_v46, %v194_v0 }
 0x1c0   :  { %v203_v5 = vsel %vm200_vm15, %v202_v56, %v198_v4 }
 0x1c1   :  { %211 = vst [vmem:[%s327_s5] sm:$0xff] %v209_v2  ;;  %v204_v6 = vmul.f32 %v203_v5, %v179_v3 }
 0x1c3   :  { %v220_v7 = vclamps-f32 %v204_v6, 1.0 }
 0x1c5   :  { %v208_v55 = vadd.f32 1.0, %v220_v7 }
 0x1c7   :  { %v210_v9 = vmul.f32 %v208_v55, %v124_v8 }
 0x1c9   :  { %212 = vst [vmem:[%s327_s5 + $0x8] sm:$0xff] %v210_v9 }

// kernel: vit_forward.15
= control target key start
LH: loop header
LB: loop body
LE: loop exit
PB: predicated region body
PF: predicated region fallthrough
CT: control target
= control target key end

     0   :  { %s183_s1 = inlined_call_operand.vmem [shape: f32[128,128], index: 1, kind: input, shape index: {}]   ;;  %s184_s2 = inlined_call_operand.vmem [shape: f32[1,128], index: 2, kind: input, shape index: {}]   ;;  %s185_s0 = inlined_call_operand.vmem [shape: f32[16,128], index: 0, kind: input, shape index: {}]   ;;  %s186_s3 = inlined_call_operand.vmem [shape: f32[16,128], index: 3, kind: input, shape index: {}]   ;;  %s187_s4 = inlined_call_operand.vmem [shape: f32[16,128], index: 4, kind: output, shape index: {}]  }
   0x1   :  { %v34_v0 = vld [vmem:[%s183_s1 + $0x78] sm:$0xff]  ;;  %v33_v1 = vld [vmem:[%s183_s1 + $0x70] sm:$0xff]  ;;  %v32_v2 = vld [vmem:[%s183_s1 + $0x68] sm:$0xff] }
   0x2   :  { %39 = vmatpush.msra.mxu0 %v34_v0  ;;  %72 = vmatpush.msra.mxu1 %v34_v0  ;;  %v31_v3 = vld [vmem:[%s183_s1 + $0x60] sm:$0xff]  ;;  %v30_v4 = vld [vmem:[%s183_s1 + $0x58] sm:$0xff]  ;;  %v29_v5 = vld [vmem:[%s183_s1 + $0x50] sm:$0xff] }
   0x3   :  { %v28_v6 = vld [vmem:[%s183_s1 + $0x48] sm:$0xff]  ;;  %v27_v7 = vld [vmem:[%s183_s1 + $0x40] sm:$0xff]  ;;  %v26_v8 = vld [vmem:[%s183_s1 + $0x38] sm:$0xff] }
   0x4   :  { %40 = vmatpush.msra.mxu0 %v33_v1  ;;  %73 = vmatpush.msra.mxu1 %v33_v1  ;;  %v25_v9 = vld [vmem:[%s183_s1 + $0x30] sm:$0xff]  ;;  %v24_v10 = vld [vmem:[%s183_s1 + $0x28] sm:$0xff]  ;;  %v23_v11 = vld [vmem:[%s183_s1 + $0x20] sm:$0xff] }
   0x5   :  { %v22_v12 = vld [vmem:[%s183_s1 + $0x18] sm:$0xff]  ;;  %v21_v13 = vld [vmem:[%s183_s1 + $0x10] sm:$0xff]  ;;  %v20_v14 = vld [vmem:[%s183_s1 + $0x8] sm:$0xff] }
   0x6   :  { %41 = vmatpush.msra.mxu0 %v32_v2  ;;  %74 = vmatpush.msra.mxu1 %v32_v2  ;;  %v19_v15 = vld [vmem:[%s183_s1] sm:$0xff]  ;;  %v18_v17 = vld [vmem:[%s185_s0 + $0x8] sm:$0xff] }
   0x7   :  { %v17_v16 = vld [vmem:[%s185_s0] sm:$0xff]  ;;  %v63_v22 = vld [vmem:[%s186_s3 + $0x8] sm:$0xff] }
   0x8   :  { %42 = vmatpush.msra.mxu0 %v31_v3  ;;  %75 = vmatpush.msra.mxu1 %v31_v3  ;;  %v88_v18 = vld [vmem:[%s184_s2] ss:$0 sm:$0xff] }
   0x9   :  { %v62_v20 = vld [vmem:[%s186_s3] sm:$0xff] }
   0xa   :  { %43 = vmatpush.msra.mxu0 %v30_v4  ;;  %76 = vmatpush.msra.mxu1 %v30_v4 }
   0xc   :  { %44 = vmatpush.msra.mxu0 %v29_v5  ;;  %77 = vmatpush.msra.mxu1 %v29_v5 }
   0xe   :  { %45 = vmatpush.msra.mxu0 %v28_v6  ;;  %78 = vmatpush.msra.mxu1 %v28_v6 }
  0x10   :  { %46 = vmatpush.msra.mxu0 %v27_v7  ;;  %79 = vmatpush.msra.mxu1 %v27_v7 }
  0x12   :  { %47 = vmatpush.msra.mxu0 %v26_v8  ;;  %80 = vmatpush.msra.mxu1 %v26_v8 }
  0x14   :  { %48 = vmatpush.msra.mxu0 %v25_v9  ;;  %81 = vmatpush.msra.mxu1 %v25_v9 }
  0x16   :  { %49 = vmatpush.msra.mxu0 %v24_v10  ;;  %82 = vmatpush.msra.mxu1 %v24_v10 }
  0x18   :  { %50 = vmatpush.msra.mxu0 %v23_v11  ;;  %83 = vmatpush.msra.mxu1 %v23_v11 }
  0x1a   :  { %51 = vmatpush.msra.mxu0 %v22_v12  ;;  %84 = vmatpush.msra.mxu1 %v22_v12 }
  0x1c   :  { %52 = vmatpush.msra.mxu0 %v21_v13  ;;  %85 = vmatpush.msra.mxu1 %v21_v13 }
  0x1e   :  { %53 = vmatpush.msra.mxu0 %v20_v14  ;;  %86 = vmatpush.msra.mxu1 %v20_v14 }
  0x20   :  { %54 = vmatpush.msra.mxu0 %v19_v15  ;;  %87 = vmatpush.msra.mxu1 %v19_v15 }
  0x21   :  { %55 = vmatmul.f32.vlgmr.msra.gmra.mxu0 %v17_v16  ;;  %58 = vmatmul.f32.vlgmr.msra.gmra.mxu1 %v18_v17 }
  0x9e   :  { %v56_v19 = vpop.f32.mrf.mxu0  ;;  %v59_v21 = vpop.f32.mrf.mxu1 }
  0x9f   :  { %v57_v23 = vadd.f32 %v88_v18, %v56_v19  ;;  %v60_v24 = vadd.f32 %v88_v18, %v59_v21 }
  0xa1   :  { %v64_v25 = vadd.f32 %v62_v20, %v57_v23  ;;  %v65_v26 = vadd.f32 %v63_v22, %v60_v24 }
  0xa3   :  { %66 = vst [vmem:[%s187_s4] sm:$0xff] %v64_v25 }
  0xa4   :  { %67 = vst [vmem:[%s187_s4 + $0x8] sm:$0xff] %v65_v26 }

// kernel: vit_forward.23
= control target key start
LH: loop header
LB: loop body
LE: loop exit
PB: predicated region body
PF: predicated region fallthrough
CT: control target
= control target key end

     0   :  { %vm21_vm0 = vcmask 261120   ;;  %v106_v2 = vmov 32.0   ;;  %s167_s0 = inlined_call_operand.vmem [shape: f32[8,32], index: 0, kind: input, shape index: {}]   ;;  %s168_s1 = inlined_call_operand.vmem [shape: f32[1,32], index: 1, kind: input, shape index: {}]   ;;  %s169_s2 = inlined_call_operand.vmem [shape: f32[1,32], index: 2, kind: input, shape index: {}]   ;;  %s170_s4 = inlined_call_operand.vmem [shape: f32[1,128], index: 4, kind: input, shape index: {}]   ;;  %s171_s3 = inlined_call_operand.vmem [shape: f32[32,128], index: 3, kind: input, shape index: {}]   ;;  %s172_s5 = inlined_call_operand.vmem [shape: f32[8,128], index: 5, kind: output, shape index: {}]  }
   0x1   :  { %v20_v0 = vld [vmem:[%s167_s0] sm:$0xff]  ;;  %102 = vrcp.f32 %v106_v2  ;;  %v64_v14 = vld [vmem:[%s171_s3 + $0x18] sm:$0xff]  ;;  %v63_v15 = vld [vmem:[%s171_s3 + $0x10] sm:$0xff] }
   0x2   :  { %v22_v1 = vsel %vm21_vm0, %v20_v0, 0.0  ;;  %84 = vmatpush.msra.mxu0 %v64_v14  ;;  %v62_v16 = vld [vmem:[%s171_s3 + $0x8] sm:$0xff]  ;;  %v61_v17 = vld [vmem:[%s171_s3] sm:$0xff] }
   0x3   :  { %23 = vadd.xlane.f32.xlu0 %v22_v1  ;;  %v99_v27 = vld [vmem:[%s168_s1] ss:$0 sm:$0xff] }
   0x4   :  { %85 = vmatpush.msra.mxu0 %v63_v15  ;;  %v100_v30 = vld [vmem:[%s169_s2] ss:$0 sm:$0xff] }
   0x5   :  { %v101_v33 = vld [vmem:[%s170_s4] ss:$0 sm:$0xff] }
   0x6   :  { %86 = vmatpush.msra.mxu0 %v62_v16 }
   0x7   :  { %v103_v3 = vpop.eup %102 }
   0x8   :  { %v26_v4 = vmul.f32 32.0, %v103_v3  ;;  %vm30_vm1 = vweird.f32 %v103_v3  ;;  %87 = vmatpush.msra.mxu0 %v61_v17 }
   0xa   :  { %v27_v5 = vsub.f32 1.0, %v26_v4 }
   0xc   :  { %v28_v6 = vmul.f32 %v103_v3, %v27_v5 }
   0xe   :  { %v29_v7 = vadd.f32 %v103_v3, %v28_v6 }
  0x10   :  { %v31_v8 = vsel %vm30_vm1, %v103_v3, %v29_v7 }
  0x76   :  { %v24_v9 = vpop.xlane.xlu0 %23 }
  0x77   :  { %v32_v10 = vmul.f32 %v31_v8, %v24_v9 }
  0x79   :  { %v33_v11 = vsub.f32 %v20_v0, %v32_v10 }
  0x7b   :  { %v34_v12 = vmul.f32 %v33_v11, %v33_v11 }
  0x7d   :  { %v35_v13 = vsel %vm21_vm0, %v34_v12, 0.0 }
  0x7e   :  { %36 = vadd.xlane.f32.xlu0 %v35_v13 }
  0xf1   :  { %v37_v18 = vpop.xlane.xlu0 %36 }
  0xf2   :  { %v38_v19 = vmul.f32 %v37_v18, %v31_v8 }
  0xf4   :  { %v39_v20 = vadd.f32 1e-05, %v38_v19 }
  0xf6   :  { %104 = vrsqrt.f32 %v39_v20  ;;  %vm46_vm3 = vweird.f32 %v39_v20 }
  0xfc   :  { %v105_v21 = vpop.eup %104 }
  0xfd   :  { %v41_v22 = vmul.f32 %v105_v21, %v39_v20  ;;  %vm47_vm2 = vweird.f32 %v105_v21 }
  0xfe   :  { %vm48_vm4 = vmor %vm46_vm3, %vm47_vm2 }
  0xff   :  { %v42_v23 = vmul.f32 %v105_v21, %v41_v22 }
 0x101   :  { %v43_v24 = vmul.f32 0.5, %v42_v23 }
 0x103   :  { %v44_v25 = vsub.f32 1.5, %v43_v24 }
 0x105   :  { %v45_v26 = vmul.f32 %v105_v21, %v44_v25 }
 0x107   :  { %v49_v28 = vsel %vm48_vm4, %v105_v21, %v45_v26 }
 0x108   :  { %v50_v29 = vmul.f32 %v49_v28, %v33_v11 }
 0x10a   :  { %v55_v31 = vmul.f32 %v99_v27, %v50_v29 }
 0x10c   :  { %v60_v32 = vadd.f32 %v100_v30, %v55_v31 }
 0x10e   :  { %97 = vmatmul.msk.f32.vlgmr.msra.gmra.mxu0 %vm21_vm0, %v60_v32 }
 0x18b   :  { %v89_v34 = vpop.f32.mrf.mxu0 }
 0x18c   :  { %v90_v35 = vadd.f32 %v101_v33, %v89_v34 }
 0x18e   :  { %92 = vst [vmem:[%s172_s5] sm:$0xff] %v90_v35 }

</bundles_post_ra>
